<compile_context>
chip_gen: v7x
topology: tpu7x:2x2x1
jax: 0.10.0
libtpu: 0.0.40
codegen_flags: <defaults>
</compile_context>

<pallas_src>
import jax
import jax.numpy as jnp
from jax import lax
from jax.experimental import pallas as pl
from jax.experimental.pallas import tpu as pltpu

EPS = 1e-5  # nn.BatchNorm2d default eps


def _round_up(a, b):
    return (a + b - 1) // b * b


def _vmem_budget_limit():
    """Generation-aware VMEM sizing: ~35% of physical for tiles, ~60% scoped limit."""
    cap = 64 * 1024 * 1024                      # conservative default (v7x per-core VMEM)
    try:
        info_fn = getattr(pltpu, "get_tpu_info", None)
        if info_fn is not None:
            cap = int(getattr(info_fn(), "vmem_capacity_bytes", cap) or cap)
    except Exception:
        pass
    return int(cap * 0.35), int(cap * 0.60)


# ----------------------------------------------------------------------------
# Kernels
# ----------------------------------------------------------------------------
def _conv_stats_kernel(x_ref, w_ref, y_ref, stat_ref):
    """Pass 1: one merged conv matmul per tile; stash bf16 y + f32 partial stats.

    x_ref   : (4, TP, K)    bf16 im2col rows (member m = pool offset (dy,dx)).
    w_ref   : (K, Cpad)     bf16 reshaped conv weight.
    y_ref   : (4, TP, Cpad) bf16 pre-BN conv output tile (stashed for pass 2).
    stat_ref: (1, 2, Cpad)  f32 per-tile partials (row 0 = sum, row 1 = sum sq).
    """
    four, tp, k = x_ref.shape
    cpad = w_ref.shape[1]
    x = x_ref[...].reshape(four * tp, k)                  # layout-preserving (tp % 8 == 0)
    y = jnp.dot(x, w_ref[...], preferred_element_type=jnp.float32)   # (4*tp, Cpad) f32
    y_ref[...] = y.reshape(four, tp, cpad).astype(y_ref.dtype)
    # NOTE: variance is later formed as E[y^2] - E[y]^2 in f32; fine for activations
    # with moderate mean/std ratio (see correctness note in the wrapper).
    s = jnp.sum(y, axis=0, keepdims=True)                 # (1, Cpad)
    sq = jnp.sum(y * y, axis=0, keepdims=True)            # (1, Cpad)
    stat_ref[...] = jnp.concatenate([s, sq], axis=0)[None]


def _bn_pool_kernel(y_ref, ss_ref, o_ref):
    """Pass 2: folded BN (0.25 pool factor included) -> ReLU -> 2x2 avg-pool.

    y_ref : (4, TP, Cpad) bf16 stashed conv output.
    ss_ref: (2, Cpad)     f32 (row 0 = scale*0.25, row 1 = shift*0.25).
    o_ref : (TP, Cpad)    bf16 pooled output tile.
    """
    scale = ss_ref[0:1, :]
    shift = ss_ref[1:2, :]
    acc = jnp.maximum(y_ref[0].astype(jnp.float32) * scale + shift, 0.0)
    for m in range(1, 4):
        acc = acc + jnp.maximum(y_ref[m].astype(jnp.float32) * scale + shift, 0.0)
    o_ref[...] = acc.astype(o_ref.dtype)


# ----------------------------------------------------------------------------
# JAX glue
# ----------------------------------------------------------------------------
def _build_patches(x_nhwc):
    """(N,H,W,C) -> (4, P, 9C) bf16 im2col, member-major (m = pool offset (dy,dx)).

    Built directly in the final layout (single XLA materialization of the 9C array)
    instead of the old concat-then-regather two-step.
    """
    N, H, W, C = x_nhwc.shape
    Ho, Wo = H // 2, W // 2
    xp = jnp.pad(x_nhwc.astype(jnp.bfloat16), ((0, 0), (1, 1), (1, 1), (0, 0)))
    mats = []
    for dy in range(2):
        for dx in range(2):
            cols = [xp[:, dy + ky: dy + ky + H: 2, dx + kx: dx + kx + W: 2, :]
                    for ky in range(3) for kx in range(3)]
            mats.append(jnp.concatenate(cols, axis=-1).reshape(N * Ho * Wo, 9 * C))
    return jnp.stack(mats, axis=0)                        # (4, P, 9C) bf16


def _choose_tile(P, K, Cpad, budget):
    """Largest pooled-row tile (multiple of 16) whose working set fits the budget."""
    cap = _round_up(P, 16)
    k_pad = _round_up(K, 128)                 # lane padding of the patches tile in VMEM
    tp = 2048
    while tp > 16:
        vmem = (2 * (4 * tp * k_pad * 2)      # bf16 patches tile, double-buffered
                + 2 * (K * Cpad * 2)          # bf16 weight (conservatively 2 buffers)
                + 2 * (4 * tp * Cpad * 2)     # bf16 y tile, double-buffered
                + (4 * tp * Cpad * 4) * 3 // 2)   # f32 matmul result + relayout slack
        if vmem <= budget:
            break
        tp //= 2
    return max(16, min(tp, cap))


def downblock2d_pallas(x_nhwc, w, gamma, beta):
    """One DownBlock2d (H, W assumed even). x_nhwc: (N,H,W,Cin), w: (3,3,Cin,Cout)."""
    N, H, W, Cin = x_nhwc.shape
    Cout = w.shape[-1]
    assert H % 2 == 0 and W % 2 == 0
    Ho, Wo = H // 2, W // 2
    P, K = N * Ho * Wo, 9 * Cin
    Cpad = _round_up(Cout, 128)
    budget, limit = _vmem_budget_limit()

    patches = _build_patches(x_nhwc)                      # (4, P, K) bf16
    TP = _choose_tile(P, K, Cpad, budget)
    Ppad = _round_up(P, TP)
    if Ppad != P:                                         # zero rows: exact for stats
        patches = jnp.pad(patches, ((0, 0), (0, Ppad - P), (0, 0)))
    grid = Ppad // TP

    w_col = jnp.pad(w.reshape(K, Cout), ((0, 0), (0, Cpad - Cout))).astype(jnp.bfloat16)

    flops1 = 2 * 4 * Ppad * K * Cpad
    patch_bytes = int(patches.size) * 2
    w_bytes = int(w_col.size) * 2
    y_bytes = 4 * Ppad * Cpad * 2

    # ---- pass 1: conv (once) + bf16 y stash + per-tile partial batch stats ----
    y, partial = pl.pallas_call(
        _conv_stats_kernel,
        out_shape=(jax.ShapeDtypeStruct((4, Ppad, Cpad), jnp.bfloat16),
                   jax.ShapeDtypeStruct((grid, 2, Cpad), jnp.float32)),
        grid=(grid,),
        in_specs=[pl.BlockSpec((4, TP, K), lambda i: (0, i, 0)),
                  pl.BlockSpec((K, Cpad), lambda i: (0, 0))],
        out_specs=[pl.BlockSpec((4, TP, Cpad), lambda i: (0, i, 0)),
                   pl.BlockSpec((1, 2, Cpad), lambda i: (i, 0, 0))],
        compiler_params=pltpu.CompilerParams(
            dimension_semantics=("parallel",), vmem_limit_bytes=limit),
        cost_estimate=pl.CostEstimate(
            flops=flops1, transcendentals=0,
            bytes_accessed=patch_bytes + w_bytes + y_bytes + grid * 2 * Cpad * 4),
    )(patches, w_col)

    # Fold training-mode BN into one per-channel FMA. The conv bias is omitted in
    # the kernels because it cancels exactly against the batch mean. The 0.25
    # average-pool factor is folded into scale/shift (0.25*relu(z) == relu(0.25*z)).
    sums = jnp.sum(partial, axis=0)                       # (2, Cpad) f32
    npix = jnp.float32(N * H * W)
    mean = sums[0] / npix
    var = jnp.maximum(sums[1] / npix - mean * mean, 0.0)
    gpad = jnp.pad(gamma, (0, Cpad - Cout))
    bpad = jnp.pad(beta, (0, Cpad - Cout))
    inv = lax.rsqrt(var + EPS)
    scale = 0.25 * gpad * inv
    shift = 0.25 * (bpad - mean * gpad * inv)
    ss = jnp.stack([scale, shift]).astype(jnp.float32)    # (2, Cpad)

    # ---- pass 2: BN apply + ReLU + 2x2 avg-pool (pure VPU), bf16 output ----
    out = pl.pallas_call(
        _bn_pool_kernel,
        out_shape=jax.ShapeDtypeStruct((Ppad, Cpad), jnp.bfloat16),
        grid=(grid,),
        in_specs=[pl.BlockSpec((4, TP, Cpad), lambda i: (0, i, 0)),
                  pl.BlockSpec((2, Cpad), lambda i: (0, 0))],
        out_specs=pl.BlockSpec((TP, Cpad), lambda i: (i, 0)),
        compiler_params=pltpu.CompilerParams(
            dimension_semantics=("parallel",), vmem_limit_bytes=limit),
        cost_estimate=pl.CostEstimate(
            flops=12 * Ppad * Cpad, transcendentals=0,
            bytes_accessed=y_bytes + Ppad * Cpad * 2 + 2 * Cpad * 4),
    )(y, ss)

    return out[:P, :Cout].reshape(N, Ho, Wo, Cout)


def encoder_forward(x_nchw, params):
    """Hourglass Encoder forward. Returns list [x, out1, out2, ...] in NHWC
    (block outputs are bf16; inter-block activations stay bf16)."""
    x = jnp.transpose(x_nchw, (0, 2, 3, 1))               # NCHW -> NHWC
    outs = [x]
    for (w, b, g, be) in params:                          # b unused: cancels in train-mode BN
        outs.append(downblock2d_pallas(outs[-1], w, g, be))
    return outs


# ----------------------------------------------------------------------------
# Deterministic parameter init (shapes follow Encoder.__init__)
# ----------------------------------------------------------------------------
def init_encoder_params(key, block_expansion, in_features, num_blocks, max_features):
    params = []
    for i in range(num_blocks):
        cin = in_features if i == 0 else min(max_features, block_expansion * 2 ** i)
        cout = min(max_features, block_expansion * 2 ** (i + 1))
        key, kw, kb, kg, kbe = jax.random.split(key, 5)
        w = 0.1 * jax.random.normal(kw, (3, 3, cin, cout), jnp.float32)
        b = 0.1 * jax.random.normal(kb, (cout,), jnp.float32)
        g = 1.0 + 0.1 * jax.random.normal(kg, (cout,), jnp.float32)
        be = 0.1 * jax.random.normal(kbe, (cout,), jnp.float32)
        params.append((w, b, g, be))
    return params


# ----------------------------------------------------------------------------
# Pure-JAX reference (same semantics as the PyTorch module, training-mode BN)
# ----------------------------------------------------------------------------
def _ref_downblock(x_nhwc, w, b, gamma, beta):
    y = lax.conv_general_dilated(
        x_nhwc.astype(jnp.float32), w, window_strides=(1, 1), padding=((1, 1), (1, 1)),
        dimension_numbers=("NHWC", "HWIO", "NHWC"),
        precision=lax.Precision.HIGHEST)
    y = y + b
    m = jnp.mean(y, axis=(0, 1, 2), keepdims=True)
    v = jnp.mean((y - m) ** 2, axis=(0, 1, 2), keepdims=True)
    y = (y - m) * lax.rsqrt(v + EPS) * gamma + beta
    y = jnp.maximum(y, 0.0)
    N, H, W, C = y.shape
    return y.reshape(N, H // 2, 2, W // 2, 2, C).mean(axis=(2, 4))


def _ref_encoder(x_nchw, params):
    x = jnp.transpose(x_nchw, (0, 2, 3, 1))
    outs = [x]
    for (w, b, g, be) in params:
        outs.append(_ref_downblock(outs[-1], w, b, g, be))
    return outs


# ----------------------------------------------------------------------------
if __name__ == "__main__":
    block_expansion, in_features, num_blocks, max_features = 8, 4, 3, 32

    key = jax.random.PRNGKey(0)
    key, kx, kp = jax.random.split(key, 3)
    x = jax.random.normal(kx, (2, in_features, 16, 16), jnp.float32)  # NCHW input
    params = init_encoder_params(kp, block_expansion, in_features, num_blocks, max_features)

    outs = jax.jit(encoder_forward)(x, params)
    outs = [jax.block_until_ready(o) for o in outs]

    refs = _ref_encoder(x, params)
    max_err = 0.0
    for o, r in zip(outs[1:], refs[1:]):
        assert o.shape == r.shape, (o.shape, r.shape)
        max_err = max(max_err, float(jnp.max(jnp.abs(o.astype(jnp.float32) - r))))
    # bf16 MXU operands / bf16 activations with f32 accumulation: loose tolerance.
    assert max_err < 1e-1, f"max abs error too large: {max_err}"

    print("KERNEL_OK")
</pallas_src>

<mosaic_0001>
module attributes {stable_mosaic.version = 11 : i64} {
  func.func @_conv_stats_kernel(%arg0: i32, %arg1: memref<4x128x36xbf16, #tpu.memory_space<vmem>>, %arg2: memref<36x128xbf16, #tpu.memory_space<vmem>>, %arg3: memref<4x128x128xbf16, #tpu.memory_space<vmem>>, %arg4: memref<1x2x128xf32, #tpu.memory_space<vmem>>) attributes {dimension_semantics = [#tpu.dimension_semantics<parallel>], iteration_bounds = array<i64: 1>, scalar_prefetch = 0 : i64, scratch_operands = 0 : i64, tpu.core_type = #tpu.core_type<tc>, window_params = [{transform_indices = @transform_0, window_bounds = array<i64: 4, 128, 36>}, {pipeline_mode = #tpu.pipeline_mode<synchronous>, transform_indices = @transform_1, window_bounds = array<i64: 36, 128>}, {transform_indices = @transform_2, window_bounds = array<i64: 4, 128, 128>}, {transform_indices = @transform_3, window_bounds = array<i64: 1, 2, 128>}]} {
    %c0 = arith.constant 0 : index
    %c0_0 = arith.constant 0 : index
    %c0_1 = arith.constant 0 : index
    %0 = vector.load %arg1[%c0, %c0_0, %c0_1] : memref<4x128x36xbf16, #tpu.memory_space<vmem>>, vector<4x128x36xbf16>
    %1 = vector.shape_cast %0 : vector<4x128x36xbf16> to vector<512x36xbf16>
    %c0_2 = arith.constant 0 : index
    %c0_3 = arith.constant 0 : index
    %2 = vector.load %arg2[%c0_2, %c0_3] : memref<36x128xbf16, #tpu.memory_space<vmem>>, vector<36x128xbf16>
    %cst = arith.constant dense<0.000000e+00> : vector<512x128xf32>
    %3 = tpu.matmul %1, %2, %cst {dimension_numbers = #tpu.dot_dimension_numbers<[1], [0], [0], [1], [0, 0, 1, 1], [], []>} : vector<512x36xbf16>, vector<36x128xbf16>, vector<512x128xf32> -> vector<512x128xf32>
    %4 = vector.shape_cast %3 : vector<512x128xf32> to vector<4x128x128xf32>
    %5 = arith.truncf %4 : vector<4x128x128xf32> to vector<4x128x128xbf16>
    %c0_4 = arith.constant 0 : index
    %c0_5 = arith.constant 0 : index
    %c0_6 = arith.constant 0 : index
    %6 = vector.load %arg3[%c0_4, %c0_5, %c0_6] : memref<4x128x128xbf16, #tpu.memory_space<vmem>>, vector<4x128x128xbf16>
    tpu.vector_store %arg3[%c0_4, %c0_5, %c0_6], %5 {strides = array<i32>} : memref<4x128x128xbf16, #tpu.memory_space<vmem>>, vector<4x128x128xbf16>,
    %cst_7 = arith.constant dense<0.000000e+00> : vector<128xf32>
    %7 = vector.multi_reduction <add>, %3, %cst_7 [0] : vector<512x128xf32> to vector<128xf32>
    %8 = vector.shape_cast %7 : vector<128xf32> to vector<1x128xf32>
    %9 = arith.mulf %3, %3 : vector<512x128xf32>
    %cst_8 = arith.constant dense<0.000000e+00> : vector<128xf32>
    %10 = vector.multi_reduction <add>, %9, %cst_8 [0] : vector<512x128xf32> to vector<128xf32>
    %11 = vector.shape_cast %10 : vector<128xf32> to vector<1x128xf32>
    %12 = tpu.concatenate %8, %11 in 0 : vector<1x128xf32>, vector<1x128xf32> -> vector<2x128xf32>
    %13 = vector.shape_cast %12 : vector<2x128xf32> to vector<1x2x128xf32>
    %c0_9 = arith.constant 0 : index
    %c0_10 = arith.constant 0 : index
    %c0_11 = arith.constant 0 : index
    %14 = vector.load %arg4[%c0_9, %c0_10, %c0_11] : memref<1x2x128xf32, #tpu.memory_space<vmem>>, vector<1x2x128xf32>
    tpu.vector_store %arg4[%c0_9, %c0_10, %c0_11], %13 {strides = array<i32>} : memref<1x2x128xf32, #tpu.memory_space<vmem>>, vector<1x2x128xf32>,
    return
  }
  func.func @transform_0(%arg0: i32) -> (i32, i32, i32) {
    %c0_i32 = arith.constant 0 : i32
    %c0_i32_0 = arith.constant 0 : i32
    %c0_i32_1 = arith.constant 0 : i32
    return %c0_i32, %arg0, %c0_i32_0 : i32, i32, i32
  }
  func.func @transform_1(%arg0: i32) -> (i32, i32) {
    %c0_i32 = arith.constant 0 : i32
    %c0_i32_0 = arith.constant 0 : i32
    %c0_i32_1 = arith.constant 0 : i32
    return %c0_i32, %c0_i32_0 : i32, i32
  }
  func.func @transform_2(%arg0: i32) -> (i32, i32, i32) {
    %c0_i32 = arith.constant 0 : i32
    %c0_i32_0 = arith.constant 0 : i32
    %c0_i32_1 = arith.constant 0 : i32
    return %c0_i32, %arg0, %c0_i32_0 : i32, i32, i32
  }
  func.func @transform_3(%arg0: i32) -> (i32, i32, i32) {
    %c0_i32 = arith.constant 0 : i32
    %c0_i32_0 = arith.constant 0 : i32
    %c0_i32_1 = arith.constant 0 : i32
    return %arg0, %c0_i32, %c0_i32_0 : i32, i32, i32
  }
}

module attributes {stable_mosaic.version = 11 : i64} {
  func.func @_bn_pool_kernel(%arg0: i32, %arg1: memref<4x128x128xbf16, #tpu.memory_space<vmem>>, %arg2: memref<2x128xf32, #tpu.memory_space<vmem>>, %arg3: memref<128x128xbf16, #tpu.memory_space<vmem>>) attributes {dimension_semantics = [#tpu.dimension_semantics<parallel>], iteration_bounds = array<i64: 1>, scalar_prefetch = 0 : i64, scratch_operands = 0 : i64, tpu.core_type = #tpu.core_type<tc>, window_params = [{transform_indices = @transform_0, window_bounds = array<i64: 4, 128, 128>}, {pipeline_mode = #tpu.pipeline_mode<synchronous>, transform_indices = @transform_1, window_bounds = array<i64: 2, 128>}, {transform_indices = @transform_2, window_bounds = array<i64: 128, 128>}]} {
    %c0 = arith.constant 0 : index
    %c0_0 = arith.constant 0 : index
    %0 = vector.load %arg2[%c0, %c0_0] : memref<2x128xf32, #tpu.memory_space<vmem>>, vector<1x128xf32>
    %c1 = arith.constant 1 : index
    %c0_1 = arith.constant 0 : index
    %1 = vector.load %arg2[%c1, %c0_1] : memref<2x128xf32, #tpu.memory_space<vmem>>, vector<1x128xf32>
    %c0_2 = arith.constant 0 : index
    %c0_3 = arith.constant 0 : index
    %c0_4 = arith.constant 0 : index
    %2 = vector.load %arg1[%c0_2, %c0_3, %c0_4] : memref<4x128x128xbf16, #tpu.memory_space<vmem>>, vector<1x128x128xbf16>
    %3 = vector.shape_cast %2 : vector<1x128x128xbf16> to vector<128x128xbf16>
    %4 = arith.extf %3 : vector<128x128xbf16> to vector<128x128xf32>
    %5 = vector.broadcast %0 : vector<1x128xf32> to vector<128x128xf32>
    %6 = arith.mulf %4, %5 : vector<128x128xf32>
    %7 = vector.broadcast %1 : vector<1x128xf32> to vector<128x128xf32>
    %8 = arith.addf %6, %7 : vector<128x128xf32>
    %cst = arith.constant 0.000000e+00 : f32
    %9 = vector.broadcast %cst : f32 to vector<128x128xf32>
    %10 = arith.maximumf %8, %9 : vector<128x128xf32>
    %c1_5 = arith.constant 1 : index
    %c0_6 = arith.constant 0 : index
    %c0_7 = arith.constant 0 : index
    %11 = vector.load %arg1[%c1_5, %c0_6, %c0_7] : memref<4x128x128xbf16, #tpu.memory_space<vmem>>, vector<1x128x128xbf16>
    %12 = vector.shape_cast %11 : vector<1x128x128xbf16> to vector<128x128xbf16>
    %13 = arith.extf %12 : vector<128x128xbf16> to vector<128x128xf32>
    %14 = vector.broadcast %0 : vector<1x128xf32> to vector<128x128xf32>
    %15 = arith.mulf %13, %14 : vector<128x128xf32>
    %16 = vector.broadcast %1 : vector<1x128xf32> to vector<128x128xf32>
    %17 = arith.addf %15, %16 : vector<128x128xf32>
    %cst_8 = arith.constant 0.000000e+00 : f32
    %18 = vector.broadcast %cst_8 : f32 to vector<128x128xf32>
    %19 = arith.maximumf %17, %18 : vector<128x128xf32>
    %20 = arith.addf %10, %19 : vector<128x128xf32>
    %c2 = arith.constant 2 : index
    %c0_9 = arith.constant 0 : index
    %c0_10 = arith.constant 0 : index
    %21 = vector.load %arg1[%c2, %c0_9, %c0_10] : memref<4x128x128xbf16, #tpu.memory_space<vmem>>, vector<1x128x128xbf16>
    %22 = vector.shape_cast %21 : vector<1x128x128xbf16> to vector<128x128xbf16>
    %23 = arith.extf %22 : vector<128x128xbf16> to vector<128x128xf32>
    %24 = vector.broadcast %0 : vector<1x128xf32> to vector<128x128xf32>
    %25 = arith.mulf %23, %24 : vector<128x128xf32>
    %26 = vector.broadcast %1 : vector<1x128xf32> to vector<128x128xf32>
    %27 = arith.addf %25, %26 : vector<128x128xf32>
    %cst_11 = arith.constant 0.000000e+00 : f32
    %28 = vector.broadcast %cst_11 : f32 to vector<128x128xf32>
    %29 = arith.maximumf %27, %28 : vector<128x128xf32>
    %30 = arith.addf %20, %29 : vector<128x128xf32>
    %c3 = arith.constant 3 : index
    %c0_12 = arith.constant 0 : index
    %c0_13 = arith.constant 0 : index
    %31 = vector.load %arg1[%c3, %c0_12, %c0_13] : memref<4x128x128xbf16, #tpu.memory_space<vmem>>, vector<1x128x128xbf16>
    %32 = vector.shape_cast %31 : vector<1x128x128xbf16> to vector<128x128xbf16>
    %33 = arith.extf %32 : vector<128x128xbf16> to vector<128x128xf32>
    %34 = vector.broadcast %0 : vector<1x128xf32> to vector<128x128xf32>
    %35 = arith.mulf %33, %34 : vector<128x128xf32>
    %36 = vector.broadcast %1 : vector<1x128xf32> to vector<128x128xf32>
    %37 = arith.addf %35, %36 : vector<128x128xf32>
    %cst_14 = arith.constant 0.000000e+00 : f32
    %38 = vector.broadcast %cst_14 : f32 to vector<128x128xf32>
    %39 = arith.maximumf %37, %38 : vector<128x128xf32>
    %40 = arith.addf %30, %39 : vector<128x128xf32>
    %41 = arith.truncf %40 : vector<128x128xf32> to vector<128x128xbf16>
    %c0_15 = arith.constant 0 : index
    %c0_16 = arith.constant 0 : index
    %42 = vector.load %arg3[%c0_15, %c0_16] : memref<128x128xbf16, #tpu.memory_space<vmem>>, vector<128x128xbf16>
    tpu.vector_store %arg3[%c0_15, %c0_16], %41 {strides = array<i32>} : memref<128x128xbf16, #tpu.memory_space<vmem>>, vector<128x128xbf16>,
    return
  }
  func.func @transform_0(%arg0: i32) -> (i32, i32, i32) {
    %c0_i32 = arith.constant 0 : i32
    %c0_i32_0 = arith.constant 0 : i32
    %c0_i32_1 = arith.constant 0 : i32
    return %c0_i32, %arg0, %c0_i32_0 : i32, i32, i32
  }
  func.func @transform_1(%arg0: i32) -> (i32, i32) {
    %c0_i32 = arith.constant 0 : i32
    %c0_i32_0 = arith.constant 0 : i32
    %c0_i32_1 = arith.constant 0 : i32
    return %c0_i32, %c0_i32_0 : i32, i32
  }
  func.func @transform_2(%arg0: i32) -> (i32, i32) {
    %c0_i32 = arith.constant 0 : i32
    %c0_i32_0 = arith.constant 0 : i32
    return %arg0, %c0_i32 : i32, i32
  }
}

module attributes {stable_mosaic.version = 11 : i64} {
  func.func @_bn_pool_kernel(%arg0: i32, %arg1: memref<4x32x128xbf16, #tpu.memory_space<vmem>>, %arg2: memref<2x128xf32, #tpu.memory_space<vmem>>, %arg3: memref<32x128xbf16, #tpu.memory_space<vmem>>) attributes {dimension_semantics = [#tpu.dimension_semantics<parallel>], iteration_bounds = array<i64: 1>, scalar_prefetch = 0 : i64, scratch_operands = 0 : i64, tpu.core_type = #tpu.core_type<tc>, window_params = [{transform_indices = @transform_0, window_bounds = array<i64: 4, 32, 128>}, {pipeline_mode = #tpu.pipeline_mode<synchronous>, transform_indices = @transform_1, window_bounds = array<i64: 2, 128>}, {transform_indices = @transform_2, window_bounds = array<i64: 32, 128>}]} {
    %c0 = arith.constant 0 : index
    %c0_0 = arith.constant 0 : index
    %0 = vector.load %arg2[%c0, %c0_0] : memref<2x128xf32, #tpu.memory_space<vmem>>, vector<1x128xf32>
    %c1 = arith.constant 1 : index
    %c0_1 = arith.constant 0 : index
    %1 = vector.load %arg2[%c1, %c0_1] : memref<2x128xf32, #tpu.memory_space<vmem>>, vector<1x128xf32>
    %c0_2 = arith.constant 0 : index
    %c0_3 = arith.constant 0 : index
    %c0_4 = arith.constant 0 : index
    %2 = vector.load %arg1[%c0_2, %c0_3, %c0_4] : memref<4x32x128xbf16, #tpu.memory_space<vmem>>, vector<1x32x128xbf16>
    %3 = vector.shape_cast %2 : vector<1x32x128xbf16> to vector<32x128xbf16>
    %4 = arith.extf %3 : vector<32x128xbf16> to vector<32x128xf32>
    %5 = vector.broadcast %0 : vector<1x128xf32> to vector<32x128xf32>
    %6 = arith.mulf %4, %5 : vector<32x128xf32>
    %7 = vector.broadcast %1 : vector<1x128xf32> to vector<32x128xf32>
    %8 = arith.addf %6, %7 : vector<32x128xf32>
    %cst = arith.constant 0.000000e+00 : f32
    %9 = vector.broadcast %cst : f32 to vector<32x128xf32>
    %10 = arith.maximumf %8, %9 : vector<32x128xf32>
    %c1_5 = arith.constant 1 : index
    %c0_6 = arith.constant 0 : index
    %c0_7 = arith.constant 0 : index
    %11 = vector.load %arg1[%c1_5, %c0_6, %c0_7] : memref<4x32x128xbf16, #tpu.memory_space<vmem>>, vector<1x32x128xbf16>
    %12 = vector.shape_cast %11 : vector<1x32x128xbf16> to vector<32x128xbf16>
    %13 = arith.extf %12 : vector<32x128xbf16> to vector<32x128xf32>
    %14 = vector.broadcast %0 : vector<1x128xf32> to vector<32x128xf32>
    %15 = arith.mulf %13, %14 : vector<32x128xf32>
    %16 = vector.broadcast %1 : vector<1x128xf32> to vector<32x128xf32>
    %17 = arith.addf %15, %16 : vector<32x128xf32>
    %cst_8 = arith.constant 0.000000e+00 : f32
    %18 = vector.broadcast %cst_8 : f32 to vector<32x128xf32>
    %19 = arith.maximumf %17, %18 : vector<32x128xf32>
    %20 = arith.addf %10, %19 : vector<32x128xf32>
    %c2 = arith.constant 2 : index
    %c0_9 = arith.constant 0 : index
    %c0_10 = arith.constant 0 : index
    %21 = vector.load %arg1[%c2, %c0_9, %c0_10] : memref<4x32x128xbf16, #tpu.memory_space<vmem>>, vector<1x32x128xbf16>
    %22 = vector.shape_cast %21 : vector<1x32x128xbf16> to vector<32x128xbf16>
    %23 = arith.extf %22 : vector<32x128xbf16> to vector<32x128xf32>
    %24 = vector.broadcast %0 : vector<1x128xf32> to vector<32x128xf32>
    %25 = arith.mulf %23, %24 : vector<32x128xf32>
    %26 = vector.broadcast %1 : vector<1x128xf32> to vector<32x128xf32>
    %27 = arith.addf %25, %26 : vector<32x128xf32>
    %cst_11 = arith.constant 0.000000e+00 : f32
    %28 = vector.broadcast %cst_11 : f32 to vector<32x128xf32>
    %29 = arith.maximumf %27, %28 : vector<32x128xf32>
    %30 = arith.addf %20, %29 : vector<32x128xf32>
    %c3 = arith.constant 3 : index
    %c0_12 = arith.constant 0 : index
    %c0_13 = arith.constant 0 : index
    %31 = vector.load %arg1[%c3, %c0_12, %c0_13] : memref<4x32x128xbf16, #tpu.memory_space<vmem>>, vector<1x32x128xbf16>
    %32 = vector.shape_cast %31 : vector<1x32x128xbf16> to vector<32x128xbf16>
    %33 = arith.extf %32 : vector<32x128xbf16> to vector<32x128xf32>
    %34 = vector.broadcast %0 : vector<1x128xf32> to vector<32x128xf32>
    %35 = arith.mulf %33, %34 : vector<32x128xf32>
    %36 = vector.broadcast %1 : vector<1x128xf32> to vector<32x128xf32>
    %37 = arith.addf %35, %36 : vector<32x128xf32>
    %cst_14 = arith.constant 0.000000e+00 : f32
    %38 = vector.broadcast %cst_14 : f32 to vector<32x128xf32>
    %39 = arith.maximumf %37, %38 : vector<32x128xf32>
    %40 = arith.addf %30, %39 : vector<32x128xf32>
    %41 = arith.truncf %40 : vector<32x128xf32> to vector<32x128xbf16>
    %c0_15 = arith.constant 0 : index
    %c0_16 = arith.constant 0 : index
    %42 = vector.load %arg3[%c0_15, %c0_16] : memref<32x128xbf16, #tpu.memory_space<vmem>>, vector<32x128xbf16>
    tpu.vector_store %arg3[%c0_15, %c0_16], %41 {strides = array<i32>} : memref<32x128xbf16, #tpu.memory_space<vmem>>, vector<32x128xbf16>,
    return
  }
  func.func @transform_0(%arg0: i32) -> (i32, i32, i32) {
    %c0_i32 = arith.constant 0 : i32
    %c0_i32_0 = arith.constant 0 : i32
    %c0_i32_1 = arith.constant 0 : i32
    return %c0_i32, %arg0, %c0_i32_0 : i32, i32, i32
  }
  func.func @transform_1(%arg0: i32) -> (i32, i32) {
    %c0_i32 = arith.constant 0 : i32
    %c0_i32_0 = arith.constant 0 : i32
    %c0_i32_1 = arith.constant 0 : i32
    return %c0_i32, %c0_i32_0 : i32, i32
  }
  func.func @transform_2(%arg0: i32) -> (i32, i32) {
    %c0_i32 = arith.constant 0 : i32
    %c0_i32_0 = arith.constant 0 : i32
    return %arg0, %c0_i32 : i32, i32
  }
}

module attributes {stable_mosaic.version = 11 : i64} {
  func.func @_conv_stats_kernel(%arg0: i32, %arg1: memref<4x32x144xbf16, #tpu.memory_space<vmem>>, %arg2: memref<144x128xbf16, #tpu.memory_space<vmem>>, %arg3: memref<4x32x128xbf16, #tpu.memory_space<vmem>>, %arg4: memref<1x2x128xf32, #tpu.memory_space<vmem>>) attributes {dimension_semantics = [#tpu.dimension_semantics<parallel>], iteration_bounds = array<i64: 1>, scalar_prefetch = 0 : i64, scratch_operands = 0 : i64, tpu.core_type = #tpu.core_type<tc>, window_params = [{transform_indices = @transform_0, window_bounds = array<i64: 4, 32, 144>}, {pipeline_mode = #tpu.pipeline_mode<synchronous>, transform_indices = @transform_1, window_bounds = array<i64: 144, 128>}, {transform_indices = @transform_2, window_bounds = array<i64: 4, 32, 128>}, {transform_indices = @transform_3, window_bounds = array<i64: 1, 2, 128>}]} {
    %c0 = arith.constant 0 : index
    %c0_0 = arith.constant 0 : index
    %c0_1 = arith.constant 0 : index
    %0 = vector.load %arg1[%c0, %c0_0, %c0_1] : memref<4x32x144xbf16, #tpu.memory_space<vmem>>, vector<4x32x144xbf16>
    %1 = vector.shape_cast %0 : vector<4x32x144xbf16> to vector<128x144xbf16>
    %c0_2 = arith.constant 0 : index
    %c0_3 = arith.constant 0 : index
    %2 = vector.load %arg2[%c0_2, %c0_3] : memref<144x128xbf16, #tpu.memory_space<vmem>>, vector<144x128xbf16>
    %cst = arith.constant dense<0.000000e+00> : vector<128x128xf32>
    %3 = tpu.matmul %1, %2, %cst {dimension_numbers = #tpu.dot_dimension_numbers<[1], [0], [0], [1], [0, 0, 1, 1], [], []>} : vector<128x144xbf16>, vector<144x128xbf16>, vector<128x128xf32> -> vector<128x128xf32>
    %4 = vector.shape_cast %3 : vector<128x128xf32> to vector<4x32x128xf32>
    %5 = arith.truncf %4 : vector<4x32x128xf32> to vector<4x32x128xbf16>
    %c0_4 = arith.constant 0 : index
    %c0_5 = arith.constant 0 : index
    %c0_6 = arith.constant 0 : index
    %6 = vector.load %arg3[%c0_4, %c0_5, %c0_6] : memref<4x32x128xbf16, #tpu.memory_space<vmem>>, vector<4x32x128xbf16>
    tpu.vector_store %arg3[%c0_4, %c0_5, %c0_6], %5 {strides = array<i32>} : memref<4x32x128xbf16, #tpu.memory_space<vmem>>, vector<4x32x128xbf16>,
    %cst_7 = arith.constant dense<0.000000e+00> : vector<128xf32>
    %7 = vector.multi_reduction <add>, %3, %cst_7 [0] : vector<128x128xf32> to vector<128xf32>
    %8 = vector.shape_cast %7 : vector<128xf32> to vector<1x128xf32>
    %9 = arith.mulf %3, %3 : vector<128x128xf32>
    %cst_8 = arith.constant dense<0.000000e+00> : vector<128xf32>
    %10 = vector.multi_reduction <add>, %9, %cst_8 [0] : vector<128x128xf32> to vector<128xf32>
    %11 = vector.shape_cast %10 : vector<128xf32> to vector<1x128xf32>
    %12 = tpu.concatenate %8, %11 in 0 : vector<1x128xf32>, vector<1x128xf32> -> vector<2x128xf32>
    %13 = vector.shape_cast %12 : vector<2x128xf32> to vector<1x2x128xf32>
    %c0_9 = arith.constant 0 : index
    %c0_10 = arith.constant 0 : index
    %c0_11 = arith.constant 0 : index
    %14 = vector.load %arg4[%c0_9, %c0_10, %c0_11] : memref<1x2x128xf32, #tpu.memory_space<vmem>>, vector<1x2x128xf32>
    tpu.vector_store %arg4[%c0_9, %c0_10, %c0_11], %13 {strides = array<i32>} : memref<1x2x128xf32, #tpu.memory_space<vmem>>, vector<1x2x128xf32>,
    return
  }
  func.func @transform_0(%arg0: i32) -> (i32, i32, i32) {
    %c0_i32 = arith.constant 0 : i32
    %c0_i32_0 = arith.constant 0 : i32
    %c0_i32_1 = arith.constant 0 : i32
    return %c0_i32, %arg0, %c0_i32_0 : i32, i32, i32
  }
  func.func @transform_1(%arg0: i32) -> (i32, i32) {
    %c0_i32 = arith.constant 0 : i32
    %c0_i32_0 = arith.constant 0 : i32
    %c0_i32_1 = arith.constant 0 : i32
    return %c0_i32, %c0_i32_0 : i32, i32
  }
  func.func @transform_2(%arg0: i32) -> (i32, i32, i32) {
    %c0_i32 = arith.constant 0 : i32
    %c0_i32_0 = arith.constant 0 : i32
    %c0_i32_1 = arith.constant 0 : i32
    return %c0_i32, %arg0, %c0_i32_0 : i32, i32, i32
  }
  func.func @transform_3(%arg0: i32) -> (i32, i32, i32) {
    %c0_i32 = arith.constant 0 : i32
    %c0_i32_0 = arith.constant 0 : i32
    %c0_i32_1 = arith.constant 0 : i32
    return %arg0, %c0_i32, %c0_i32_0 : i32, i32, i32
  }
}

module attributes {stable_mosaic.version = 11 : i64} {
  func.func @_conv_stats_kernel(%arg0: i32, %arg1: memref<4x16x288xbf16, #tpu.memory_space<vmem>>, %arg2: memref<288x128xbf16, #tpu.memory_space<vmem>>, %arg3: memref<4x16x128xbf16, #tpu.memory_space<vmem>>, %arg4: memref<1x2x128xf32, #tpu.memory_space<vmem>>) attributes {dimension_semantics = [#tpu.dimension_semantics<parallel>], iteration_bounds = array<i64: 1>, scalar_prefetch = 0 : i64, scratch_operands = 0 : i64, tpu.core_type = #tpu.core_type<tc>, window_params = [{transform_indices = @transform_0, window_bounds = array<i64: 4, 16, 288>}, {pipeline_mode = #tpu.pipeline_mode<synchronous>, transform_indices = @transform_1, window_bounds = array<i64: 288, 128>}, {transform_indices = @transform_2, window_bounds = array<i64: 4, 16, 128>}, {transform_indices = @transform_3, window_bounds = array<i64: 1, 2, 128>}]} {
    %c0 = arith.constant 0 : index
    %c0_0 = arith.constant 0 : index
    %c0_1 = arith.constant 0 : index
    %0 = vector.load %arg1[%c0, %c0_0, %c0_1] : memref<4x16x288xbf16, #tpu.memory_space<vmem>>, vector<4x16x288xbf16>
    %1 = vector.shape_cast %0 : vector<4x16x288xbf16> to vector<64x288xbf16>
    %c0_2 = arith.constant 0 : index
    %c0_3 = arith.constant 0 : index
    %2 = vector.load %arg2[%c0_2, %c0_3] : memref<288x128xbf16, #tpu.memory_space<vmem>>, vector<288x128xbf16>
    %cst = arith.constant dense<0.000000e+00> : vector<64x128xf32>
    %3 = tpu.matmul %1, %2, %cst {dimension_numbers = #tpu.dot_dimension_numbers<[1], [0], [0], [1], [0, 0, 1, 1], [], []>} : vector<64x288xbf16>, vector<288x128xbf16>, vector<64x128xf32> -> vector<64x128xf32>
    %4 = vector.shape_cast %3 : vector<64x128xf32> to vector<4x16x128xf32>
    %5 = arith.truncf %4 : vector<4x16x128xf32> to vector<4x16x128xbf16>
    %c0_4 = arith.constant 0 : index
    %c0_5 = arith.constant 0 : index
    %c0_6 = arith.constant 0 : index
    %6 = vector.load %arg3[%c0_4, %c0_5, %c0_6] : memref<4x16x128xbf16, #tpu.memory_space<vmem>>, vector<4x16x128xbf16>
    tpu.vector_store %arg3[%c0_4, %c0_5, %c0_6], %5 {strides = array<i32>} : memref<4x16x128xbf16, #tpu.memory_space<vmem>>, vector<4x16x128xbf16>,
    %cst_7 = arith.constant dense<0.000000e+00> : vector<128xf32>
    %7 = vector.multi_reduction <add>, %3, %cst_7 [0] : vector<64x128xf32> to vector<128xf32>
    %8 = vector.shape_cast %7 : vector<128xf32> to vector<1x128xf32>
    %9 = arith.mulf %3, %3 : vector<64x128xf32>
    %cst_8 = arith.constant dense<0.000000e+00> : vector<128xf32>
    %10 = vector.multi_reduction <add>, %9, %cst_8 [0] : vector<64x128xf32> to vector<128xf32>
    %11 = vector.shape_cast %10 : vector<128xf32> to vector<1x128xf32>
    %12 = tpu.concatenate %8, %11 in 0 : vector<1x128xf32>, vector<1x128xf32> -> vector<2x128xf32>
    %13 = vector.shape_cast %12 : vector<2x128xf32> to vector<1x2x128xf32>
    %c0_9 = arith.constant 0 : index
    %c0_10 = arith.constant 0 : index
    %c0_11 = arith.constant 0 : index
    %14 = vector.load %arg4[%c0_9, %c0_10, %c0_11] : memref<1x2x128xf32, #tpu.memory_space<vmem>>, vector<1x2x128xf32>
    tpu.vector_store %arg4[%c0_9, %c0_10, %c0_11], %13 {strides = array<i32>} : memref<1x2x128xf32, #tpu.memory_space<vmem>>, vector<1x2x128xf32>,
    return
  }
  func.func @transform_0(%arg0: i32) -> (i32, i32, i32) {
    %c0_i32 = arith.constant 0 : i32
    %c0_i32_0 = arith.constant 0 : i32
    %c0_i32_1 = arith.constant 0 : i32
    return %c0_i32, %arg0, %c0_i32_0 : i32, i32, i32
  }
  func.func @transform_1(%arg0: i32) -> (i32, i32) {
    %c0_i32 = arith.constant 0 : i32
    %c0_i32_0 = arith.constant 0 : i32
    %c0_i32_1 = arith.constant 0 : i32
    return %c0_i32, %c0_i32_0 : i32, i32
  }
  func.func @transform_2(%arg0: i32) -> (i32, i32, i32) {
    %c0_i32 = arith.constant 0 : i32
    %c0_i32_0 = arith.constant 0 : i32
    %c0_i32_1 = arith.constant 0 : i32
    return %c0_i32, %arg0, %c0_i32_0 : i32, i32, i32
  }
  func.func @transform_3(%arg0: i32) -> (i32, i32, i32) {
    %c0_i32 = arith.constant 0 : i32
    %c0_i32_0 = arith.constant 0 : i32
    %c0_i32_1 = arith.constant 0 : i32
    return %arg0, %c0_i32, %c0_i32_0 : i32, i32, i32
  }
}

module attributes {stable_mosaic.version = 11 : i64} {
  func.func @_bn_pool_kernel(%arg0: i32, %arg1: memref<4x16x128xbf16, #tpu.memory_space<vmem>>, %arg2: memref<2x128xf32, #tpu.memory_space<vmem>>, %arg3: memref<16x128xbf16, #tpu.memory_space<vmem>>) attributes {dimension_semantics = [#tpu.dimension_semantics<parallel>], iteration_bounds = array<i64: 1>, scalar_prefetch = 0 : i64, scratch_operands = 0 : i64, tpu.core_type = #tpu.core_type<tc>, window_params = [{transform_indices = @transform_0, window_bounds = array<i64: 4, 16, 128>}, {pipeline_mode = #tpu.pipeline_mode<synchronous>, transform_indices = @transform_1, window_bounds = array<i64: 2, 128>}, {transform_indices = @transform_2, window_bounds = array<i64: 16, 128>}]} {
    %c0 = arith.constant 0 : index
    %c0_0 = arith.constant 0 : index
    %0 = vector.load %arg2[%c0, %c0_0] : memref<2x128xf32, #tpu.memory_space<vmem>>, vector<1x128xf32>
    %c1 = arith.constant 1 : index
    %c0_1 = arith.constant 0 : index
    %1 = vector.load %arg2[%c1, %c0_1] : memref<2x128xf32, #tpu.memory_space<vmem>>, vector<1x128xf32>
    %c0_2 = arith.constant 0 : index
    %c0_3 = arith.constant 0 : index
    %c0_4 = arith.constant 0 : index
    %2 = vector.load %arg1[%c0_2, %c0_3, %c0_4] : memref<4x16x128xbf16, #tpu.memory_space<vmem>>, vector<1x16x128xbf16>
    %3 = vector.shape_cast %2 : vector<1x16x128xbf16> to vector<16x128xbf16>
    %4 = arith.extf %3 : vector<16x128xbf16> to vector<16x128xf32>
    %5 = vector.broadcast %0 : vector<1x128xf32> to vector<16x128xf32>
    %6 = arith.mulf %4, %5 : vector<16x128xf32>
    %7 = vector.broadcast %1 : vector<1x128xf32> to vector<16x128xf32>
    %8 = arith.addf %6, %7 : vector<16x128xf32>
    %cst = arith.constant 0.000000e+00 : f32
    %9 = vector.broadcast %cst : f32 to vector<16x128xf32>
    %10 = arith.maximumf %8, %9 : vector<16x128xf32>
    %c1_5 = arith.constant 1 : index
    %c0_6 = arith.constant 0 : index
    %c0_7 = arith.constant 0 : index
    %11 = vector.load %arg1[%c1_5, %c0_6, %c0_7] : memref<4x16x128xbf16, #tpu.memory_space<vmem>>, vector<1x16x128xbf16>
    %12 = vector.shape_cast %11 : vector<1x16x128xbf16> to vector<16x128xbf16>
    %13 = arith.extf %12 : vector<16x128xbf16> to vector<16x128xf32>
    %14 = vector.broadcast %0 : vector<1x128xf32> to vector<16x128xf32>
    %15 = arith.mulf %13, %14 : vector<16x128xf32>
    %16 = vector.broadcast %1 : vector<1x128xf32> to vector<16x128xf32>
    %17 = arith.addf %15, %16 : vector<16x128xf32>
    %cst_8 = arith.constant 0.000000e+00 : f32
    %18 = vector.broadcast %cst_8 : f32 to vector<16x128xf32>
    %19 = arith.maximumf %17, %18 : vector<16x128xf32>
    %20 = arith.addf %10, %19 : vector<16x128xf32>
    %c2 = arith.constant 2 : index
    %c0_9 = arith.constant 0 : index
    %c0_10 = arith.constant 0 : index
    %21 = vector.load %arg1[%c2, %c0_9, %c0_10] : memref<4x16x128xbf16, #tpu.memory_space<vmem>>, vector<1x16x128xbf16>
    %22 = vector.shape_cast %21 : vector<1x16x128xbf16> to vector<16x128xbf16>
    %23 = arith.extf %22 : vector<16x128xbf16> to vector<16x128xf32>
    %24 = vector.broadcast %0 : vector<1x128xf32> to vector<16x128xf32>
    %25 = arith.mulf %23, %24 : vector<16x128xf32>
    %26 = vector.broadcast %1 : vector<1x128xf32> to vector<16x128xf32>
    %27 = arith.addf %25, %26 : vector<16x128xf32>
    %cst_11 = arith.constant 0.000000e+00 : f32
    %28 = vector.broadcast %cst_11 : f32 to vector<16x128xf32>
    %29 = arith.maximumf %27, %28 : vector<16x128xf32>
    %30 = arith.addf %20, %29 : vector<16x128xf32>
    %c3 = arith.constant 3 : index
    %c0_12 = arith.constant 0 : index
    %c0_13 = arith.constant 0 : index
    %31 = vector.load %arg1[%c3, %c0_12, %c0_13] : memref<4x16x128xbf16, #tpu.memory_space<vmem>>, vector<1x16x128xbf16>
    %32 = vector.shape_cast %31 : vector<1x16x128xbf16> to vector<16x128xbf16>
    %33 = arith.extf %32 : vector<16x128xbf16> to vector<16x128xf32>
    %34 = vector.broadcast %0 : vector<1x128xf32> to vector<16x128xf32>
    %35 = arith.mulf %33, %34 : vector<16x128xf32>
    %36 = vector.broadcast %1 : vector<1x128xf32> to vector<16x128xf32>
    %37 = arith.addf %35, %36 : vector<16x128xf32>
    %cst_14 = arith.constant 0.000000e+00 : f32
    %38 = vector.broadcast %cst_14 : f32 to vector<16x128xf32>
    %39 = arith.maximumf %37, %38 : vector<16x128xf32>
    %40 = arith.addf %30, %39 : vector<16x128xf32>
    %41 = arith.truncf %40 : vector<16x128xf32> to vector<16x128xbf16>
    %c0_15 = arith.constant 0 : index
    %c0_16 = arith.constant 0 : index
    %42 = vector.load %arg3[%c0_15, %c0_16] : memref<16x128xbf16, #tpu.memory_space<vmem>>, vector<16x128xbf16>
    tpu.vector_store %arg3[%c0_15, %c0_16], %41 {strides = array<i32>} : memref<16x128xbf16, #tpu.memory_space<vmem>>, vector<16x128xbf16>,
    return
  }
  func.func @transform_0(%arg0: i32) -> (i32, i32, i32) {
    %c0_i32 = arith.constant 0 : i32
    %c0_i32_0 = arith.constant 0 : i32
    %c0_i32_1 = arith.constant 0 : i32
    return %c0_i32, %arg0, %c0_i32_0 : i32, i32, i32
  }
  func.func @transform_1(%arg0: i32) -> (i32, i32) {
    %c0_i32 = arith.constant 0 : i32
    %c0_i32_0 = arith.constant 0 : i32
    %c0_i32_1 = arith.constant 0 : i32
    return %c0_i32, %c0_i32_0 : i32, i32
  }
  func.func @transform_2(%arg0: i32) -> (i32, i32) {
    %c0_i32 = arith.constant 0 : i32
    %c0_i32_0 = arith.constant 0 : i32
    return %arg0, %c0_i32 : i32, i32
  }
}

</mosaic_0001>

<bundles_post_ra>
// kernel: encoder_forward.7
= control target key start
LH: loop header
LB: loop body
LE: loop exit
PB: predicated region body
PF: predicated region fallthrough
CT: control target
= control target key end

     0   :  { %s1037_s0 = inlined_call_operand.vmem [shape: bf16[4,128,128], index: 0, kind: input, shape index: {}]   ;;  %s1038_s1 = inlined_call_operand.vmem [shape: f32[2,128], index: 1, kind: input, shape index: {}]   ;;  %s1039_s2 = inlined_call_operand.vmem [shape: bf16[128,128], index: 2, kind: output, shape index: {}]  }
   0x1   :  { %v782_v0 = vld [vmem:[%s1038_s1] ss:$0 sm:$0xff]  ;;  %v799_v7 = vld [vmem:[%s1038_s1 + $0x1] ss:$0 sm:$0xff]  ;;  %v726_v28 = vld [vmem:[%s1037_s0 + $0x8] sm:$0xff]  }
   0x2   :  { %v559_v1 = vld [vmem:[%s1037_s0] sm:$0xff]   ;;  %v734_v33 = vld [vmem:[%s1037_s0 + $0x48] sm:$0xff]   ;;  %v564_v41 = vunpack.c.l.bf16 %v726_v28  ;;  %v565_v42 = vunpack.c.h.bf16 %v726_v28 }
   0x3   :  { %v560_v2 = vunpack.c.l.bf16 %v559_v1  ;;  %v561_v3 = vunpack.c.h.bf16 %v559_v1  ;;  %v733_v4 = vld [vmem:[%s1037_s0 + $0x40] sm:$0xff]   ;;  %v742_v38 = vld [vmem:[%s1037_s0 + $0x88] sm:$0xff]   ;;  %v596_v45 = vunpack.c.l.bf16 %v734_v33  ;;  %v597_v46 = vunpack.c.h.bf16 %v734_v33  ;;  %v727_v1 = vld [vmem:[%s1037_s0 + $0x10] sm:$0xff]  }
   0x4   :  { %v741_v5 = vld [vmem:[%s1037_s0 + $0x80] sm:$0xff]   ;;  %v592_v8 = vunpack.c.l.bf16 %v733_v4  ;;  %v593_v9 = vunpack.c.h.bf16 %v733_v4  ;;  %v51_v47 = vmul.f32 %v564_v41, %v782_v0  ;;  %v52_v48 = vmul.f32 %v565_v42, %v782_v0  ;;  %v750_v59 = vld [vmem:[%s1037_s0 + $0xc8] sm:$0xff]   ;;  %v728_v42 = vld [vmem:[%s1037_s0 + $0x18] sm:$0xff]  }
   0x5   :  { %v749_v6 = vld [vmem:[%s1037_s0 + $0xc0] sm:$0xff]   ;;  %v624_v10 = vunpack.c.l.bf16 %v741_v5  ;;  %v625_v11 = vunpack.c.h.bf16 %v741_v5  ;;  %v49_v12 = vmul.f32 %v560_v2, %v782_v0  ;;  %v50_v13 = vmul.f32 %v561_v3, %v782_v0 }
   0x6   :  { %v656_v14 = vunpack.c.l.bf16 %v749_v6  ;;  %v657_v15 = vunpack.c.h.bf16 %v749_v6  ;;  %v134_v16 = vmul.f32 %v592_v8, %v782_v0  ;;  %v135_v17 = vmul.f32 %v593_v9, %v782_v0 }
   0x7   :  { %v231_v18 = vmul.f32 %v624_v10, %v782_v0  ;;  %v232_v19 = vmul.f32 %v625_v11, %v782_v0  ;;  %v69_v20 = vadd.f32 %v799_v7, %v49_v12  ;;  %v70_v21 = vadd.f32 %v799_v7, %v50_v13  ;;  %v735_v11 = vld [vmem:[%s1037_s0 + $0x50] sm:$0xff]  }
   0x8   :  { %v328_v22 = vmul.f32 %v656_v14, %v782_v0  ;;  %v329_v23 = vmul.f32 %v657_v15, %v782_v0  ;;  %v150_v24 = vadd.f32 %v799_v7, %v134_v16  ;;  %v151_v25 = vadd.f32 %v799_v7, %v135_v17 }
   0x9   :  { %v247_v26 = vadd.f32 %v799_v7, %v231_v18  ;;  %v248_v27 = vadd.f32 %v799_v7, %v232_v19  ;;  %v85_v29 = vmax.f32 %v69_v20, 0.0  ;;  %v86_v30 = vmax.f32 %v70_v21, 0.0 }
   0xa   :  { %v344_v31 = vadd.f32 %v799_v7, %v328_v22  ;;  %v345_v32 = vadd.f32 %v799_v7, %v329_v23  ;;  %v166_v34 = vmax.f32 %v150_v24, 0.0  ;;  %v167_v35 = vmax.f32 %v151_v25, 0.0  ;;  %v743_v24 = vld [vmem:[%s1037_s0 + $0x90] sm:$0xff]  }
   0xb   :  { %v263_v36 = vmax.f32 %v247_v26, 0.0  ;;  %v264_v37 = vmax.f32 %v248_v27, 0.0  ;;  %v628_v49 = vunpack.c.l.bf16 %v742_v38  ;;  %v629_v50 = vunpack.c.h.bf16 %v742_v38 }
   0xc   :  { %v360_v39 = vmax.f32 %v344_v31, 0.0  ;;  %v361_v40 = vmax.f32 %v345_v32, 0.0  ;;  %v182_v43 = vadd.f32 %v166_v34, %v85_v29  ;;  %v183_v44 = vadd.f32 %v167_v35, %v86_v30 }
   0xd   :  { %v136_v53 = vmul.f32 %v596_v45, %v782_v0  ;;  %v137_v54 = vmul.f32 %v597_v46, %v782_v0  ;;  %v71_v55 = vadd.f32 %v799_v7, %v51_v47  ;;  %v72_v56 = vadd.f32 %v799_v7, %v52_v48 }
   0xe   :  { %v279_v51 = vadd.f32 %v263_v36, %v182_v43  ;;  %v280_v52 = vadd.f32 %v264_v37, %v183_v44  ;;  %v233_v57 = vmul.f32 %v628_v49, %v782_v0  ;;  %v234_v58 = vmul.f32 %v629_v50, %v782_v0  ;;  %v751_v37 = vld [vmem:[%s1037_s0 + $0xd0] sm:$0xff]  }
   0xf   :  { %v152_v62 = vadd.f32 %v799_v7, %v136_v53  ;;  %v153_v63 = vadd.f32 %v799_v7, %v137_v54  ;;  %v87_v2 = vmax.f32 %v71_v55, 0.0  ;;  %v88_v3 = vmax.f32 %v72_v56, 0.0  ;;  %v736_v55 = vld [vmem:[%s1037_s0 + $0x58] sm:$0xff]  }
  0x10   :  { %v376_v60 = vadd.f32 %v360_v39, %v279_v51  ;;  %v377_v61 = vadd.f32 %v361_v40, %v280_v52  ;;  %v249_v4 = vadd.f32 %v799_v7, %v233_v57  ;;  %v250_v5 = vadd.f32 %v799_v7, %v234_v58 }
  0x11   :  { %v168_v8 = vmax.f32 %v152_v62, 0.0  ;;  %v169_v9 = vmax.f32 %v153_v63, 0.0  ;;  %v660_v10 = vunpack.c.l.bf16 %v750_v59  ;;  %v661_v14 = vunpack.c.h.bf16 %v750_v59 }
  0x12   :  { %v689_v6 = vpack.c.bf16 %v377_v61, %v376_v60  ;;  %v265_v12 = vmax.f32 %v249_v4, 0.0  ;;  %v266_v13 = vmax.f32 %v250_v5, 0.0  ;;  %v568_v15 = vunpack.c.l.bf16 %v727_v1  ;;  %v744_v5 = vld [vmem:[%s1037_s0 + $0x98] sm:$0xff]  }
  0x13   :  { %v184_v16 = vadd.f32 %v168_v8, %v87_v2  ;;  %v185_v17 = vadd.f32 %v169_v9, %v88_v3  ;;  %v330_v18 = vmul.f32 %v660_v10, %v782_v0  ;;  %v569_v19 = vunpack.c.h.bf16 %v727_v1 }
  0x14   :  { %690 = vst [vmem:[%s1039_s2] sm:$0xff] %v689_v6   ;;  %v331_v20 = vmul.f32 %v661_v14, %v782_v0  ;;  %v53_v21 = vmul.f32 %v568_v15, %v782_v0  ;;  %v600_v22 = vunpack.c.l.bf16 %v735_v11  ;;  %v601_v23 = vunpack.c.h.bf16 %v735_v11 }
  0x15   :  { %v281_v25 = vadd.f32 %v265_v12, %v184_v16  ;;  %v282_v26 = vadd.f32 %v266_v13, %v185_v17  ;;  %v346_v27 = vadd.f32 %v799_v7, %v330_v18  ;;  %v54_v28 = vmul.f32 %v569_v19, %v782_v0  ;;  %v752_v19 = vld [vmem:[%s1037_s0 + $0xd8] sm:$0xff]  }
  0x16   :  { %v347_v29 = vadd.f32 %v799_v7, %v331_v20  ;;  %v73_v30 = vadd.f32 %v799_v7, %v53_v21  ;;  %v138_v31 = vmul.f32 %v600_v22, %v782_v0  ;;  %v139_v32 = vmul.f32 %v601_v23, %v782_v0 }
  0x17   :  { %v362_v33 = vmax.f32 %v346_v27, 0.0  ;;  %v74_v34 = vadd.f32 %v799_v7, %v54_v28  ;;  %v632_v35 = vunpack.c.l.bf16 %v743_v24  ;;  %v633_v36 = vunpack.c.h.bf16 %v743_v24  ;;  %v729_v24 = vld [vmem:[%s1037_s0 + $0x20] sm:$0xff]  }
  0x18   :  { %v363_v38 = vmax.f32 %v347_v29, 0.0  ;;  %v89_v39 = vmax.f32 %v73_v30, 0.0  ;;  %v154_v40 = vadd.f32 %v799_v7, %v138_v31  ;;  %v155_v41 = vadd.f32 %v799_v7, %v139_v32 }
  0x19   :  { %v378_v43 = vadd.f32 %v362_v33, %v281_v25  ;;  %v90_v44 = vmax.f32 %v74_v34, 0.0  ;;  %v235_v45 = vmul.f32 %v632_v35, %v782_v0  ;;  %v236_v46 = vmul.f32 %v633_v36, %v782_v0 }
  0x1a   :  { %v379_v47 = vadd.f32 %v363_v38, %v282_v26  ;;  %v170_v48 = vmax.f32 %v154_v40, 0.0  ;;  %v171_v49 = vmax.f32 %v155_v41, 0.0  ;;  %v664_v50 = vunpack.c.l.bf16 %v751_v37 }
  0x1b   :  { %v251_v51 = vadd.f32 %v799_v7, %v235_v45  ;;  %v252_v52 = vadd.f32 %v799_v7, %v236_v46  ;;  %v665_v53 = vunpack.c.h.bf16 %v751_v37  ;;  %v572_v54 = vunpack.c.l.bf16 %v728_v42  ;;  %v737_v37 = vld [vmem:[%s1037_s0 + $0x60] sm:$0xff]  }
  0x1c   :  { %v694_v56 = vpack.c.bf16 %v379_v47, %v378_v43  ;;  %v186_v57 = vadd.f32 %v170_v48, %v89_v39  ;;  %v187_v58 = vadd.f32 %v171_v49, %v90_v44  ;;  %v332_v59 = vmul.f32 %v664_v50, %v782_v0  ;;  %v745_v50 = vld [vmem:[%s1037_s0 + $0xa0] sm:$0xff]  }
  0x1d   :  { %v267_v60 = vmax.f32 %v251_v51, 0.0  ;;  %v268_v61 = vmax.f32 %v252_v52, 0.0  ;;  %v333_v62 = vmul.f32 %v665_v53, %v782_v0  ;;  %v573_v63 = vunpack.c.h.bf16 %v728_v42 }
  0x1e   :  { %757 = vst [vmem:[%s1039_s2 + $0x8] sm:$0xff] %v694_v56   ;;  %v348_v1 = vadd.f32 %v799_v7, %v332_v59  ;;  %v55_v2 = vmul.f32 %v572_v54, %v782_v0  ;;  %v604_v3 = vunpack.c.l.bf16 %v736_v55  ;;  %v605_v4 = vunpack.c.h.bf16 %v736_v55  ;;  %v753_v59 = vld [vmem:[%s1037_s0 + $0xe0] sm:$0xff]  }
  0x1f   :  { %v283_v6 = vadd.f32 %v267_v60, %v186_v57  ;;  %v284_v8 = vadd.f32 %v268_v61, %v187_v58  ;;  %v349_v9 = vadd.f32 %v799_v7, %v333_v62  ;;  %v56_v10 = vmul.f32 %v573_v63, %v782_v0 }
  0x20   :  { %v364_v11 = vmax.f32 %v348_v1, 0.0  ;;  %v75_v12 = vadd.f32 %v799_v7, %v55_v2  ;;  %v140_v13 = vmul.f32 %v604_v3, %v782_v0  ;;  %v141_v14 = vmul.f32 %v605_v4, %v782_v0 }
  0x21   :  { %v365_v15 = vmax.f32 %v349_v9, 0.0  ;;  %v76_v16 = vadd.f32 %v799_v7, %v56_v10  ;;  %v636_v17 = vunpack.c.l.bf16 %v744_v5  ;;  %v637_v18 = vunpack.c.h.bf16 %v744_v5  ;;  %v730_v5 = vld [vmem:[%s1037_s0 + $0x28] sm:$0xff]  }
  0x22   :  { %v380_v20 = vadd.f32 %v364_v11, %v283_v6  ;;  %v91_v21 = vmax.f32 %v75_v12, 0.0  ;;  %v156_v22 = vadd.f32 %v799_v7, %v140_v13  ;;  %v157_v23 = vadd.f32 %v799_v7, %v141_v14 }
  0x23   :  { %v381_v25 = vadd.f32 %v365_v15, %v284_v8  ;;  %v92_v26 = vmax.f32 %v76_v16, 0.0  ;;  %v237_v27 = vmul.f32 %v636_v17, %v782_v0  ;;  %v238_v28 = vmul.f32 %v637_v18, %v782_v0 }
  0x24   :  { %v172_v29 = vmax.f32 %v156_v22, 0.0  ;;  %v173_v30 = vmax.f32 %v157_v23, 0.0  ;;  %v668_v31 = vunpack.c.l.bf16 %v752_v19  ;;  %v669_v32 = vunpack.c.h.bf16 %v752_v19  ;;  %v738_v19 = vld [vmem:[%s1037_s0 + $0x68] sm:$0xff]  }
  0x25   :  { %v699_v33 = vpack.c.bf16 %v381_v25, %v380_v20  ;;  %v253_v34 = vadd.f32 %v799_v7, %v237_v27  ;;  %v254_v35 = vadd.f32 %v799_v7, %v238_v28  ;;  %v576_v36 = vunpack.c.l.bf16 %v729_v24 }
  0x26   :  { %v188_v38 = vadd.f32 %v172_v29, %v91_v21  ;;  %v189_v39 = vadd.f32 %v173_v30, %v92_v26  ;;  %v334_v40 = vmul.f32 %v668_v31, %v782_v0  ;;  %v335_v41 = vmul.f32 %v669_v32, %v782_v0  ;;  %v746_v32 = vld [vmem:[%s1037_s0 + $0xa8] sm:$0xff]  }
  0x27   :  { %758 = vst [vmem:[%s1039_s2 + $0x10] sm:$0xff] %v699_v33   ;;  %v269_v42 = vmax.f32 %v253_v34, 0.0  ;;  %v270_v43 = vmax.f32 %v254_v35, 0.0  ;;  %v577_v44 = vunpack.c.h.bf16 %v729_v24  ;;  %v57_v45 = vmul.f32 %v576_v36, %v782_v0 }
  0x28   :  { %v350_v46 = vadd.f32 %v799_v7, %v334_v40  ;;  %v351_v47 = vadd.f32 %v799_v7, %v335_v41  ;;  %v608_v48 = vunpack.c.l.bf16 %v737_v37  ;;  %v609_v49 = vunpack.c.h.bf16 %v737_v37  ;;  %v754_v41 = vld [vmem:[%s1037_s0 + $0xe8] sm:$0xff]  }
  0x29   :  { %v285_v51 = vadd.f32 %v269_v42, %v188_v38  ;;  %v286_v52 = vadd.f32 %v270_v43, %v189_v39  ;;  %v58_v53 = vmul.f32 %v577_v44, %v782_v0  ;;  %v77_v54 = vadd.f32 %v799_v7, %v57_v45 }
  0x2a   :  { %v366_v55 = vmax.f32 %v350_v46, 0.0  ;;  %v367_v56 = vmax.f32 %v351_v47, 0.0  ;;  %v142_v57 = vmul.f32 %v608_v48, %v782_v0  ;;  %v143_v58 = vmul.f32 %v609_v49, %v782_v0  ;;  %v731_v46 = vld [vmem:[%s1037_s0 + $0x30] sm:$0xff]  }
  0x2b   :  { %v78_v60 = vadd.f32 %v799_v7, %v58_v53  ;;  %v93_v61 = vmax.f32 %v77_v54, 0.0  ;;  %v640_v62 = vunpack.c.l.bf16 %v745_v50  ;;  %v641_v63 = vunpack.c.h.bf16 %v745_v50 }
  0x2c   :  { %v382_v1 = vadd.f32 %v366_v55, %v285_v51  ;;  %v383_v2 = vadd.f32 %v367_v56, %v286_v52  ;;  %v158_v3 = vadd.f32 %v799_v7, %v142_v57  ;;  %v159_v4 = vadd.f32 %v799_v7, %v143_v58 }
  0x2d   :  { %v94_v6 = vmax.f32 %v78_v60, 0.0  ;;  %v239_v8 = vmul.f32 %v640_v62, %v782_v0  ;;  %v240_v9 = vmul.f32 %v641_v63, %v782_v0  ;;  %v672_v10 = vunpack.c.l.bf16 %v753_v59  ;;  %v739_v63 = vld [vmem:[%s1037_s0 + $0x70] sm:$0xff]  }
  0x2e   :  { %v704_v11 = vpack.c.bf16 %v383_v2, %v382_v1  ;;  %v174_v12 = vmax.f32 %v158_v3, 0.0  ;;  %v175_v13 = vmax.f32 %v159_v4, 0.0  ;;  %v673_v14 = vunpack.c.h.bf16 %v753_v59 }
  0x2f   :  { %v255_v15 = vadd.f32 %v799_v7, %v239_v8  ;;  %v256_v16 = vadd.f32 %v799_v7, %v240_v9  ;;  %v336_v17 = vmul.f32 %v672_v10, %v782_v0  ;;  %v580_v18 = vunpack.c.l.bf16 %v730_v5 }
  0x30   :  { %759 = vst [vmem:[%s1039_s2 + $0x18] sm:$0xff] %v704_v11   ;;  %v190_v20 = vadd.f32 %v174_v12, %v93_v61  ;;  %v191_v21 = vadd.f32 %v175_v13, %v94_v6  ;;  %v337_v22 = vmul.f32 %v673_v14, %v782_v0  ;;  %v581_v23 = vunpack.c.h.bf16 %v730_v5  ;;  %v747_v14 = vld [vmem:[%s1037_s0 + $0xb0] sm:$0xff]  }
  0x31   :  { %v271_v24 = vmax.f32 %v255_v15, 0.0  ;;  %v272_v25 = vmax.f32 %v256_v16, 0.0  ;;  %v352_v26 = vadd.f32 %v799_v7, %v336_v17  ;;  %v59_v27 = vmul.f32 %v580_v18, %v782_v0 }
  0x32   :  { %v353_v28 = vadd.f32 %v799_v7, %v337_v22  ;;  %v60_v29 = vmul.f32 %v581_v23, %v782_v0  ;;  %v612_v30 = vunpack.c.l.bf16 %v738_v19  ;;  %v613_v31 = vunpack.c.h.bf16 %v738_v19  ;;  %v755_v19 = vld [vmem:[%s1037_s0 + $0xf0] sm:$0xff]  }
  0x33   :  { %v287_v33 = vadd.f32 %v271_v24, %v190_v20  ;;  %v288_v34 = vadd.f32 %v272_v25, %v191_v21  ;;  %v368_v35 = vmax.f32 %v352_v26, 0.0  ;;  %v79_v36 = vadd.f32 %v799_v7, %v59_v27 }
  0x34   :  { %v369_v37 = vmax.f32 %v353_v28, 0.0  ;;  %v80_v38 = vadd.f32 %v799_v7, %v60_v29  ;;  %v144_v39 = vmul.f32 %v612_v30, %v782_v0  ;;  %v145_v40 = vmul.f32 %v613_v31, %v782_v0  ;;  %v732_v28 = vld [vmem:[%s1037_s0 + $0x38] sm:$0xff]  }
  0x35   :  { %v384_v42 = vadd.f32 %v368_v35, %v287_v33  ;;  %v95_v43 = vmax.f32 %v79_v36, 0.0  ;;  %v644_v44 = vunpack.c.l.bf16 %v746_v32  ;;  %v645_v45 = vunpack.c.h.bf16 %v746_v32 }
  0x36   :  { %v385_v47 = vadd.f32 %v369_v37, %v288_v34  ;;  %v96_v48 = vmax.f32 %v80_v38, 0.0  ;;  %v160_v49 = vadd.f32 %v799_v7, %v144_v39  ;;  %v161_v50 = vadd.f32 %v799_v7, %v145_v40 }
  0x37   :  { %v241_v51 = vmul.f32 %v644_v44, %v782_v0  ;;  %v242_v52 = vmul.f32 %v645_v45, %v782_v0  ;;  %v676_v53 = vunpack.c.l.bf16 %v754_v41  ;;  %v677_v54 = vunpack.c.h.bf16 %v754_v41  ;;  %v740_v45 = vld [vmem:[%s1037_s0 + $0x78] sm:$0xff]  }
  0x38   :  { %v709_v55 = vpack.c.bf16 %v385_v47, %v384_v42  ;;  %v176_v56 = vmax.f32 %v160_v49, 0.0  ;;  %v177_v57 = vmax.f32 %v161_v50, 0.0  ;;  %v584_v58 = vunpack.c.l.bf16 %v731_v46 }
  0x39   :  { %v257_v59 = vadd.f32 %v799_v7, %v241_v51  ;;  %v258_v60 = vadd.f32 %v799_v7, %v242_v52  ;;  %v338_v61 = vmul.f32 %v676_v53, %v782_v0  ;;  %v339_v62 = vmul.f32 %v677_v54, %v782_v0  ;;  %v748_v54 = vld [vmem:[%s1037_s0 + $0xb8] sm:$0xff]  }
  0x3a   :  { %760 = vst [vmem:[%s1039_s2 + $0x20] sm:$0xff] %v709_v55   ;;  %v192_v1 = vadd.f32 %v176_v56, %v95_v43  ;;  %v193_v2 = vadd.f32 %v177_v57, %v96_v48  ;;  %v585_v3 = vunpack.c.h.bf16 %v731_v46  ;;  %v61_v4 = vmul.f32 %v584_v58, %v782_v0 }
  0x3b   :  { %v273_v5 = vmax.f32 %v257_v59, 0.0  ;;  %v274_v6 = vmax.f32 %v258_v60, 0.0  ;;  %v354_v8 = vadd.f32 %v799_v7, %v338_v61  ;;  %v355_v9 = vadd.f32 %v799_v7, %v339_v62 }
  0x3c   :  { %v62_v10 = vmul.f32 %v585_v3, %v782_v0  ;;  %v81_v11 = vadd.f32 %v799_v7, %v61_v4  ;;  %v616_v12 = vunpack.c.l.bf16 %v739_v63  ;;  %v617_v13 = vunpack.c.h.bf16 %v739_v63  ;;  %v756_v63 = vld [vmem:[%s1037_s0 + $0xf8] sm:$0xff]  }
  0x3d   :  { %v289_v15 = vadd.f32 %v273_v5, %v192_v1  ;;  %v290_v16 = vadd.f32 %v274_v6, %v193_v2  ;;  %v370_v17 = vmax.f32 %v354_v8, 0.0  ;;  %v371_v18 = vmax.f32 %v355_v9, 0.0 }
  0x3e   :  { %v82_v20 = vadd.f32 %v799_v7, %v62_v10  ;;  %v97_v21 = vmax.f32 %v81_v11, 0.0  ;;  %v146_v22 = vmul.f32 %v616_v12, %v782_v0  ;;  %v147_v23 = vmul.f32 %v617_v13, %v782_v0 }
  0x3f   :  { %v386_v24 = vadd.f32 %v370_v17, %v289_v15  ;;  %v387_v25 = vadd.f32 %v371_v18, %v290_v16  ;;  %v648_v26 = vunpack.c.l.bf16 %v747_v14  ;;  %v649_v27 = vunpack.c.h.bf16 %v747_v14 }
  0x40   :  { %v98_v29 = vmax.f32 %v82_v20, 0.0  ;;  %v162_v30 = vadd.f32 %v799_v7, %v146_v22  ;;  %v163_v31 = vadd.f32 %v799_v7, %v147_v23  ;;  %v680_v32 = vunpack.c.l.bf16 %v755_v19 }
  0x41   :  { %v714_v33 = vpack.c.bf16 %v387_v25, %v386_v24  ;;  %v243_v34 = vmul.f32 %v648_v26, %v782_v0  ;;  %v244_v35 = vmul.f32 %v649_v27, %v782_v0  ;;  %v681_v36 = vunpack.c.h.bf16 %v755_v19 }
  0x42   :  { %v178_v37 = vmax.f32 %v162_v30, 0.0  ;;  %v179_v38 = vmax.f32 %v163_v31, 0.0  ;;  %v340_v39 = vmul.f32 %v680_v32, %v782_v0  ;;  %v588_v40 = vunpack.c.l.bf16 %v732_v28 }
  0x43   :  { %761 = vst [vmem:[%s1039_s2 + $0x28] sm:$0xff] %v714_v33   ;;  %v259_v41 = vadd.f32 %v799_v7, %v243_v34  ;;  %v260_v42 = vadd.f32 %v799_v7, %v244_v35  ;;  %v341_v43 = vmul.f32 %v681_v36, %v782_v0  ;;  %v589_v44 = vunpack.c.h.bf16 %v732_v28 }
  0x44   :  { %v194_v46 = vadd.f32 %v178_v37, %v97_v21  ;;  %v195_v47 = vadd.f32 %v179_v38, %v98_v29  ;;  %v356_v48 = vadd.f32 %v799_v7, %v340_v39  ;;  %v63_v49 = vmul.f32 %v588_v40, %v782_v0 }
  0x45   :  { %v275_v50 = vmax.f32 %v259_v41, 0.0  ;;  %v276_v51 = vmax.f32 %v260_v42, 0.0  ;;  %v357_v52 = vadd.f32 %v799_v7, %v341_v43  ;;  %v64_v53 = vmul.f32 %v589_v44, %v782_v0 }
  0x46   :  { %v372_v55 = vmax.f32 %v356_v48, 0.0  ;;  %v83_v56 = vadd.f32 %v799_v7, %v63_v49  ;;  %v620_v57 = vunpack.c.l.bf16 %v740_v45  ;;  %v621_v58 = vunpack.c.h.bf16 %v740_v45 }
  0x47   :  { %v291_v59 = vadd.f32 %v275_v50, %v194_v46  ;;  %v292_v60 = vadd.f32 %v276_v51, %v195_v47  ;;  %v373_v61 = vmax.f32 %v357_v52, 0.0  ;;  %v84_v62 = vadd.f32 %v799_v7, %v64_v53 }
  0x48   :  { %v99_v1 = vmax.f32 %v83_v56, 0.0  ;;  %v148_v2 = vmul.f32 %v620_v57, %v782_v0  ;;  %v149_v3 = vmul.f32 %v621_v58, %v782_v0  ;;  %v652_v4 = vunpack.c.l.bf16 %v748_v54 }
  0x49   :  { %v388_v5 = vadd.f32 %v372_v55, %v291_v59  ;;  %v389_v6 = vadd.f32 %v373_v61, %v292_v60  ;;  %v100_v8 = vmax.f32 %v84_v62, 0.0  ;;  %v653_v9 = vunpack.c.h.bf16 %v748_v54 }
  0x4a   :  { %v164_v10 = vadd.f32 %v799_v7, %v148_v2  ;;  %v165_v11 = vadd.f32 %v799_v7, %v149_v3  ;;  %v245_v12 = vmul.f32 %v652_v4, %v782_v0  ;;  %v684_v13 = vunpack.c.l.bf16 %v756_v63 }
  0x4b   :  { %v719_v14 = vpack.c.bf16 %v389_v6, %v388_v5  ;;  %v246_v15 = vmul.f32 %v653_v9, %v782_v0  ;;  %v685_v16 = vunpack.c.h.bf16 %v756_v63 }
  0x4c   :  { %v180_v17 = vmax.f32 %v164_v10, 0.0  ;;  %v181_v18 = vmax.f32 %v165_v11, 0.0  ;;  %v261_v19 = vadd.f32 %v799_v7, %v245_v12  ;;  %v342_v20 = vmul.f32 %v684_v13, %v782_v0 }
  0x4d   :  { %762 = vst [vmem:[%s1039_s2 + $0x30] sm:$0xff] %v719_v14   ;;  %v262_v21 = vadd.f32 %v799_v7, %v246_v15  ;;  %v343_v22 = vmul.f32 %v685_v16, %v782_v0 }
  0x4e   :  { %v196_v23 = vadd.f32 %v180_v17, %v99_v1  ;;  %v197_v24 = vadd.f32 %v181_v18, %v100_v8  ;;  %v277_v25 = vmax.f32 %v261_v19, 0.0  ;;  %v358_v26 = vadd.f32 %v799_v7, %v342_v20 }
  0x4f   :  { %v278_v27 = vmax.f32 %v262_v21, 0.0  ;;  %v359_v28 = vadd.f32 %v799_v7, %v343_v22 }
  0x50   :  { %v293_v29 = vadd.f32 %v277_v25, %v196_v23  ;;  %v374_v30 = vmax.f32 %v358_v26, 0.0 }
  0x51   :  { %v294_v31 = vadd.f32 %v278_v27, %v197_v24  ;;  %v375_v32 = vmax.f32 %v359_v28, 0.0 }
  0x52   :  { %v390_v33 = vadd.f32 %v374_v30, %v293_v29 }
  0x53   :  { %v391_v34 = vadd.f32 %v375_v32, %v294_v31 }
  0x55   :  { %v724_v35 = vpack.c.bf16 %v391_v34, %v390_v33 }
  0x57   :  { %763 = vst [vmem:[%s1039_s2 + $0x38] sm:$0xff] %v724_v35  }

// kernel: encoder_forward.6
= control target key start
LH: loop header
LB: loop body
LE: loop exit
PB: predicated region body
PF: predicated region fallthrough
CT: control target
= control target key end

     0   :  { %vm258_vm0 = vcmask 293888   ;;  %vm355_vm1 = vcmask 1041408   ;;  %vm1170_vm2 = vcmask 1040384   ;;  %s2163_s1 = inlined_call_operand.vmem [shape: bf16[36,128], index: 1, kind: input, shape index: {}]   ;;  %s2164_s0 = inlined_call_operand.vmem [shape: bf16[4,128,36], index: 0, kind: input, shape index: {}]   ;;  %s2165_s2 = inlined_call_operand.vmem [shape: bf16[4,128,128], index: 2, kind: output, shape index: {0}]   ;;  %s2166_s3 = inlined_call_operand.vmem [shape: f32[1,2,128], index: 3, kind: output, shape index: {1}]  }
   0x1   :  { %v1680_v0 = vld [vmem:[%s2163_s1] sm:$0xff]   ;;  %v1681_v1 = vld [vmem:[%s2163_s1 + $0x8] sm:$0xff]   ;;  %v1682_v2 = vld [vmem:[%s2163_s1 + $0x10] ss:$0 sps:$4 sm:$0x33]  }
   0x2   :  { %1602 = vmatprep.subr.bf16.mxu0 %v1680_v0  ;;  %v1683_v3 = vld [vmem:[%s2164_s0] sm:$0xff]   ;;  %1672 = vmatprep.subr.bf16.mxu1 %v1680_v0  ;;  %v357_v4 = vsel %vm355_vm1, %v1682_v2, 0  ;;  %v1684_v5 = vld [vmem:[%s2164_s0 + $0x8] sm:$0xff]   ;;  %v1685_v6 = vld [vmem:[%s2164_s0 + $0x10] sm:$0xff]  }
   0x3   :  { %1603 = vmatpush3.bf16.msra.mxu0 %v1680_v0  ;;  %1675 = vmatpush3.bf16.msra.mxu1 %v1680_v0  ;;  %v1686_v7 = vld [vmem:[%s2164_s0 + $0x18] sm:$0xff]   ;;  %v1687_v8 = vld [vmem:[%s2164_s0 + $0x20] sm:$0xff]   ;;  %v1700_v10 = vld [vmem:[%s2164_s0 + $0x88] sm:$0xff]  }
   0x4   :  { %1604 = vmatprep.subr.bf16.mxu0 %v1681_v1  ;;  %1608 = vmatprep.mubr.msk.bf16.mxu0 %vm258_vm0, %v1683_v3  ;;  %v1699_v9 = vld [vmem:[%s2164_s0 + $0x80] sm:$0xff]   ;;  %v1701_v11 = vld [vmem:[%s2164_s0 + $0x90] sm:$0xff]   ;;  %v1688_v12 = vld [vmem:[%s2164_s0 + $0x28] sm:$0xff]  }
   0x5   :  { %1673 = vmatprep.subr.bf16.mxu1 %v1681_v1  ;;  %1640 = vmatprep.mubr.msk.bf16.mxu1 %vm258_vm0, %v1699_v9  ;;  %v1689_v13 = vld [vmem:[%s2164_s0 + $0x30] sm:$0xff]   ;;  %v1702_v14 = vld [vmem:[%s2164_s0 + $0x98] sm:$0xff]   ;;  %v1703_v15 = vld [vmem:[%s2164_s0 + $0xa0] sm:$0xff]  }
   0x6   :  { %v1690_v16 = vld [vmem:[%s2164_s0 + $0x38] sm:$0xff]   ;;  %v1704_v17 = vld [vmem:[%s2164_s0 + $0xa8] sm:$0xff]   ;;  %v1691_v18 = vld [vmem:[%s2164_s0 + $0x40] sm:$0xff]  }
   0x7   :  { %1605 = vmatpush3.bf16.msra.mxu0 %v1681_v1  ;;  %1676 = vmatpush3.bf16.msra.mxu1 %v1681_v1  ;;  %v1705_v19 = vld [vmem:[%s2164_s0 + $0xb0] sm:$0xff]   ;;  %v1692_v20 = vld [vmem:[%s2164_s0 + $0x48] sm:$0xff]   ;;  %v1706_v21 = vld [vmem:[%s2164_s0 + $0xb8] sm:$0xff]  }
   0x8   :  { %1678 = vmatprep.subr.msk.bf16.mxu0 %vm355_vm1, %v1682_v2  ;;  %1679 = vmatprep.subr.msk.bf16.mxu1 %vm355_vm1, %v1682_v2  ;;  %v1693_v22 = vld [vmem:[%s2164_s0 + $0x50] sm:$0xff]   ;;  %v1707_v23 = vld [vmem:[%s2164_s0 + $0xc0] sm:$0xff]   ;;  %v1694_v24 = vld [vmem:[%s2164_s0 + $0x58] sm:$0xff]  }
   0x9   :  { %v1708_v25 = vld [vmem:[%s2164_s0 + $0xc8] sm:$0xff]   ;;  %v1695_v26 = vld [vmem:[%s2164_s0 + $0x60] sm:$0xff]   ;;  %v1709_v27 = vld [vmem:[%s2164_s0 + $0xd0] sm:$0xff]  }
   0xa   :  { %v1696_v28 = vld [vmem:[%s2164_s0 + $0x68] sm:$0xff]   ;;  %v1710_v29 = vld [vmem:[%s2164_s0 + $0xd8] sm:$0xff]   ;;  %v1697_v30 = vld [vmem:[%s2164_s0 + $0x70] sm:$0xff]  }
   0xb   :  { %1607 = vmatpush3.bf16.msra.mxu0 %v357_v4  ;;  %1677 = vmatpush3.bf16.msra.mxu1 %v357_v4  ;;  %v1711_v31 = vld [vmem:[%s2164_s0 + $0xe0] sm:$0xff]   ;;  %v1698_v32 = vld [vmem:[%s2164_s0 + $0x78] sm:$0xff]   ;;  %v1712_v33 = vld [vmem:[%s2164_s0 + $0xe8] sm:$0xff]  }
   0xc   :  { %v1713_v34 = vld [vmem:[%s2164_s0 + $0xf0] sm:$0xff]   ;;  %v1714_v35 = vld [vmem:[%s2164_s0 + $0xf8] sm:$0xff]  }
   0xe   :  { %1609 = vmatmul.mubr.msk.bf16.vlgmr.msra.gmra.mrb[0].mxu0 %vm258_vm0, %v1684_v5  ;;  %1641 = vmatmul.mubr.msk.bf16.vlgmr.msra.gmra.mrb[0].mxu1 %vm258_vm0, %v1700_v10 }
   0xf   :  { %1612 = vmatprep.mubr.msk.bf16.mxu0 %vm258_vm0, %v1685_v6  ;;  %1644 = vmatprep.mubr.msk.bf16.mxu1 %vm258_vm0, %v1701_v11 }
  0x16   :  { %1613 = vmatmul.mubr.msk.bf16.gmra.mrb[4].mxu0 %vm258_vm0, %v1686_v7  ;;  %1645 = vmatmul.mubr.msk.bf16.gmra.mrb[4].mxu1 %vm258_vm0, %v1702_v14 }
  0x17   :  { %1616 = vmatprep.mubr.msk.bf16.mxu0 %vm258_vm0, %v1687_v8  ;;  %1648 = vmatprep.mubr.msk.bf16.mxu1 %vm258_vm0, %v1703_v15 }
  0x1e   :  { %1617 = vmatmul.mubr.msk.bf16.gmra.mrb[8].mxu0 %vm258_vm0, %v1688_v12  ;;  %1649 = vmatmul.mubr.msk.bf16.gmra.mrb[8].mxu1 %vm258_vm0, %v1704_v17 }
  0x1f   :  { %1620 = vmatprep.mubr.msk.bf16.mxu0 %vm258_vm0, %v1689_v13  ;;  %1652 = vmatprep.mubr.msk.bf16.mxu1 %vm258_vm0, %v1705_v19 }
  0x26   :  { %1621 = vmatmul.mubr.msk.bf16.gmra.mrb[12].mxu0 %vm258_vm0, %v1690_v16  ;;  %1653 = vmatmul.mubr.msk.bf16.gmra.mrb[12].mxu1 %vm258_vm0, %v1706_v21 }
  0x27   :  { %1624 = vmatprep.mubr.msk.bf16.mxu0 %vm258_vm0, %v1691_v18  ;;  %1656 = vmatprep.mubr.msk.bf16.mxu1 %vm258_vm0, %v1707_v23 }
  0x2e   :  { %1625 = vmatmul.mubr.msk.bf16.gmra.mrb[16].mxu0 %vm258_vm0, %v1692_v20  ;;  %1657 = vmatmul.mubr.msk.bf16.gmra.mrb[16].mxu1 %vm258_vm0, %v1708_v25 }
  0x2f   :  { %1628 = vmatprep.mubr.msk.bf16.mxu0 %vm258_vm0, %v1693_v22  ;;  %1660 = vmatprep.mubr.msk.bf16.mxu1 %vm258_vm0, %v1709_v27 }
  0x36   :  { %1629 = vmatmul.mubr.msk.bf16.gmra.mrb[20].mxu0 %vm258_vm0, %v1694_v24  ;;  %1661 = vmatmul.mubr.msk.bf16.gmra.mrb[20].mxu1 %vm258_vm0, %v1710_v29 }
  0x37   :  { %1632 = vmatprep.mubr.msk.bf16.mxu0 %vm258_vm0, %v1695_v26  ;;  %1664 = vmatprep.mubr.msk.bf16.mxu1 %vm258_vm0, %v1711_v31 }
  0x3e   :  { %1633 = vmatmul.mubr.msk.bf16.gmra.mrb[24].mxu0 %vm258_vm0, %v1696_v28  ;;  %1665 = vmatmul.mubr.msk.bf16.gmra.mrb[24].mxu1 %vm258_vm0, %v1712_v33 }
  0x3f   :  { %1636 = vmatprep.mubr.msk.bf16.mxu0 %vm258_vm0, %v1697_v30  ;;  %1668 = vmatprep.mubr.msk.bf16.mxu1 %vm258_vm0, %v1713_v34 }
  0x46   :  { %1637 = vmatmul.mubr.msk.bf16.gmra.mrb[28].mxu0 %vm258_vm0, %v1698_v32  ;;  %1669 = vmatmul.mubr.msk.bf16.gmra.mrb[28].mxu1 %vm258_vm0, %v1714_v35 }
  0xe1   :  { %v1610_v36 = vpop.f32.mrb[0].mxu0  ;;  %v1878_v52 = vpop.f32.mrb[0].mxu1 }
  0xe2   :  { %v393_v37 = vpop.f32.mrb[1].mxu0  ;;  %v1039_v45 = vmul.f32 %v1610_v36, %v1610_v36  ;;  %v1880_v54 = vpop.f32.mrb[1].mxu1 }
  0xe3   :  { %v1611_v38 = vpop.f32.mrb[2].mxu0  ;;  %v1037_v41 = vmul.f32 %v393_v37, %v393_v37  ;;  %v1882_v59 = vpop.f32.mrb[2].mxu1 }
  0xe4   :  { %v1384_v39 = vpack.c.bf16 %v1611_v38, %v1610_v36  ;;  %v396_v40 = vpop.f32.mrb[3].mxu0  ;;  %v1040_v48 = vmul.f32 %v1611_v38, %v1611_v38  ;;  %v1464_v62 = vpack.c.bf16 %v1882_v59, %v1878_v52  ;;  %v1886_v63 = vpop.f32.mrb[3].mxu1 }
  0xe5   :  { %v1379_v42 = vpack.c.bf16 %v396_v40, %v393_v37  ;;  %v968_v43 = vadd.f32 %v396_v40, %v393_v37  ;;  %v1038_v44 = vmul.f32 %v396_v40, %v396_v40  ;;  %v1459_v4 = vpack.c.bf16 %v1886_v63, %v1880_v54 }
  0xe6   :  { %1536 = vst [vmem:[%s2165_s2 + $0x8] sm:$0xff] %v1384_v39   ;;  %1552 = vst [vmem:[%s2165_s2 + $0x88] sm:$0xff] %v1464_v62  }
  0xe7   :  { %1380 = vst [vmem:[%s2165_s2] sm:$0xff] %v1379_v42   ;;  %v969_v46 = vadd.f32 %v1610_v36, %v968_v43  ;;  %v1101_v47 = vadd.f32 %v1038_v44, %v1037_v41  ;;  %1551 = vst [vmem:[%s2165_s2 + $0x80] sm:$0xff] %v1459_v4  }
  0xe9   :  { %v1102_v49 = vadd.f32 %v1101_v47, %v1039_v45  ;;  %v1614_v50 = vpop.f32.mrb[4].mxu0  ;;  %v970_v51 = vadd.f32 %v1611_v38, %v969_v46  ;;  %v1902_v12 = vpop.f32.mrb[4].mxu1 }
  0xea   :  { %v409_v53 = vpop.f32.mrb[5].mxu0  ;;  %v1043_v5 = vmul.f32 %v1614_v50, %v1614_v50  ;;  %v1904_v14 = vpop.f32.mrb[5].mxu1 }
  0xeb   :  { %v971_v55 = vadd.f32 %v970_v51, %v409_v53  ;;  %v1041_v56 = vmul.f32 %v409_v53, %v409_v53  ;;  %v1103_v57 = vadd.f32 %v1102_v49, %v1040_v48  ;;  %v1615_v58 = vpop.f32.mrb[6].mxu0  ;;  %v1906_v19 = vpop.f32.mrb[6].mxu1 }
  0xec   :  { %v1394_v60 = vpack.c.bf16 %v1615_v58, %v1614_v50  ;;  %v412_v61 = vpop.f32.mrb[7].mxu0  ;;  %v1044_v8 = vmul.f32 %v1615_v58, %v1615_v58  ;;  %v1474_v22 = vpack.c.bf16 %v1906_v19, %v1902_v12  ;;  %v1910_v23 = vpop.f32.mrb[7].mxu1 }
  0xed   :  { %v1104_v0 = vadd.f32 %v1103_v57, %v1041_v56  ;;  %v1389_v1 = vpack.c.bf16 %v412_v61, %v409_v53  ;;  %v972_v2 = vadd.f32 %v971_v55, %v412_v61  ;;  %v1042_v3 = vmul.f32 %v412_v61, %v412_v61 }
  0xee   :  { %1538 = vst [vmem:[%s2165_s2 + $0x18] sm:$0xff] %v1394_v60   ;;  %1554 = vst [vmem:[%s2165_s2 + $0x98] sm:$0xff] %v1474_v22   ;;  %v1469_v28 = vpack.c.bf16 %v1910_v23, %v1904_v14 }
  0xef   :  { %1537 = vst [vmem:[%s2165_s2 + $0x10] sm:$0xff] %v1389_v1   ;;  %v973_v6 = vadd.f32 %v1614_v50, %v972_v2  ;;  %v1105_v7 = vadd.f32 %v1104_v0, %v1042_v3 }
  0xf0   :  { %1553 = vst [vmem:[%s2165_s2 + $0x90] sm:$0xff] %v1469_v28  }
  0xf1   :  { %v1106_v9 = vadd.f32 %v1105_v7, %v1043_v5  ;;  %v1618_v10 = vpop.f32.mrb[8].mxu0  ;;  %v974_v11 = vadd.f32 %v1615_v58, %v973_v6  ;;  %v1926_v36 = vpop.f32.mrb[8].mxu1 }
  0xf2   :  { %v425_v13 = vpop.f32.mrb[9].mxu0  ;;  %v1047_v29 = vmul.f32 %v1618_v10, %v1618_v10  ;;  %v1928_v38 = vpop.f32.mrb[9].mxu1 }
  0xf3   :  { %v975_v15 = vadd.f32 %v974_v11, %v425_v13  ;;  %v1045_v16 = vmul.f32 %v425_v13, %v425_v13  ;;  %v1107_v17 = vadd.f32 %v1106_v9, %v1044_v8  ;;  %v1619_v18 = vpop.f32.mrb[10].mxu0  ;;  %v1930_v43 = vpop.f32.mrb[10].mxu1 }
  0xf4   :  { %v1404_v20 = vpack.c.bf16 %v1619_v18, %v1618_v10  ;;  %v428_v21 = vpop.f32.mrb[11].mxu0  ;;  %v1048_v32 = vmul.f32 %v1619_v18, %v1619_v18  ;;  %v1484_v46 = vpack.c.bf16 %v1930_v43, %v1926_v36  ;;  %v1934_v47 = vpop.f32.mrb[11].mxu1 }
  0xf5   :  { %v1108_v24 = vadd.f32 %v1107_v17, %v1045_v16  ;;  %v1399_v25 = vpack.c.bf16 %v428_v21, %v425_v13  ;;  %v976_v26 = vadd.f32 %v975_v15, %v428_v21  ;;  %v1046_v27 = vmul.f32 %v428_v21, %v428_v21 }
  0xf6   :  { %1540 = vst [vmem:[%s2165_s2 + $0x28] sm:$0xff] %v1404_v20   ;;  %1556 = vst [vmem:[%s2165_s2 + $0xa8] sm:$0xff] %v1484_v46   ;;  %v1479_v53 = vpack.c.bf16 %v1934_v47, %v1928_v38 }
  0xf7   :  { %1539 = vst [vmem:[%s2165_s2 + $0x20] sm:$0xff] %v1399_v25   ;;  %v977_v30 = vadd.f32 %v1618_v10, %v976_v26  ;;  %v1109_v31 = vadd.f32 %v1108_v24, %v1046_v27 }
  0xf8   :  { %1555 = vst [vmem:[%s2165_s2 + $0xa0] sm:$0xff] %v1479_v53  }
  0xf9   :  { %v1110_v33 = vadd.f32 %v1109_v31, %v1047_v29  ;;  %v1622_v34 = vpop.f32.mrb[12].mxu0  ;;  %v978_v35 = vadd.f32 %v1619_v18, %v977_v30  ;;  %v1950_v0 = vpop.f32.mrb[12].mxu1 }
  0xfa   :  { %v441_v37 = vpop.f32.mrb[13].mxu0  ;;  %v1051_v55 = vmul.f32 %v1622_v34, %v1622_v34  ;;  %v1952_v2 = vpop.f32.mrb[13].mxu1 }
  0xfb   :  { %v979_v39 = vadd.f32 %v978_v35, %v441_v37  ;;  %v1049_v40 = vmul.f32 %v441_v37, %v441_v37  ;;  %v1111_v41 = vadd.f32 %v1110_v33, %v1048_v32  ;;  %v1623_v42 = vpop.f32.mrb[14].mxu0  ;;  %v1954_v7 = vpop.f32.mrb[14].mxu1 }
  0xfc   :  { %v1414_v44 = vpack.c.bf16 %v1623_v42, %v1622_v34  ;;  %v444_v45 = vpop.f32.mrb[15].mxu0  ;;  %v1052_v58 = vmul.f32 %v1623_v42, %v1623_v42  ;;  %v1494_v10 = vpack.c.bf16 %v1954_v7, %v1950_v0  ;;  %v1958_v11 = vpop.f32.mrb[15].mxu1 }
  0xfd   :  { %v1112_v48 = vadd.f32 %v1111_v41, %v1049_v40  ;;  %v1409_v49 = vpack.c.bf16 %v444_v45, %v441_v37  ;;  %v980_v50 = vadd.f32 %v979_v39, %v444_v45  ;;  %v1050_v51 = vmul.f32 %v444_v45, %v444_v45 }
  0xfe   :  { %1542 = vst [vmem:[%s2165_s2 + $0x38] sm:$0xff] %v1414_v44   ;;  %1558 = vst [vmem:[%s2165_s2 + $0xb8] sm:$0xff] %v1494_v10   ;;  %v1489_v18 = vpack.c.bf16 %v1958_v11, %v1952_v2 }
  0xff   :  { %1541 = vst [vmem:[%s2165_s2 + $0x30] sm:$0xff] %v1409_v49   ;;  %v981_v56 = vadd.f32 %v1622_v34, %v980_v50  ;;  %v1113_v57 = vadd.f32 %v1112_v48, %v1050_v51 }
 0x100   :  { %1557 = vst [vmem:[%s2165_s2 + $0xb0] sm:$0xff] %v1489_v18  }
 0x101   :  { %v1114_v60 = vadd.f32 %v1113_v57, %v1051_v55  ;;  %v1626_v61 = vpop.f32.mrb[16].mxu0  ;;  %v982_v62 = vadd.f32 %v1623_v42, %v981_v56  ;;  %v1974_v28 = vpop.f32.mrb[16].mxu1 }
 0x102   :  { %v457_v1 = vpop.f32.mrb[17].mxu0  ;;  %v1055_v20 = vmul.f32 %v1626_v61, %v1626_v61  ;;  %v1976_v30 = vpop.f32.mrb[17].mxu1 }
 0x103   :  { %v983_v3 = vadd.f32 %v982_v62, %v457_v1  ;;  %v1053_v4 = vmul.f32 %v457_v1, %v457_v1  ;;  %v1115_v5 = vadd.f32 %v1114_v60, %v1052_v58  ;;  %v1627_v6 = vpop.f32.mrb[18].mxu0  ;;  %v1978_v35 = vpop.f32.mrb[18].mxu1 }
 0x104   :  { %v1424_v8 = vpack.c.bf16 %v1627_v6, %v1626_v61  ;;  %v460_v9 = vpop.f32.mrb[19].mxu0  ;;  %v1056_v24 = vmul.f32 %v1627_v6, %v1627_v6  ;;  %v1504_v40 = vpack.c.bf16 %v1978_v35, %v1974_v28  ;;  %v1982_v41 = vpop.f32.mrb[19].mxu1 }
 0x105   :  { %v1116_v13 = vadd.f32 %v1115_v5, %v1053_v4  ;;  %v1419_v15 = vpack.c.bf16 %v460_v9, %v457_v1  ;;  %v984_v16 = vadd.f32 %v983_v3, %v460_v9  ;;  %v1054_v17 = vmul.f32 %v460_v9, %v460_v9 }
 0x106   :  { %1544 = vst [vmem:[%s2165_s2 + $0x48] sm:$0xff] %v1424_v8   ;;  %1560 = vst [vmem:[%s2165_s2 + $0xc8] sm:$0xff] %v1504_v40   ;;  %v1499_v48 = vpack.c.bf16 %v1982_v41, %v1976_v30 }
 0x107   :  { %1543 = vst [vmem:[%s2165_s2 + $0x40] sm:$0xff] %v1419_v15   ;;  %v985_v21 = vadd.f32 %v1626_v61, %v984_v16  ;;  %v1117_v22 = vadd.f32 %v1116_v13, %v1054_v17 }
 0x108   :  { %1559 = vst [vmem:[%s2165_s2 + $0xc0] sm:$0xff] %v1499_v48  }
 0x109   :  { %v1118_v25 = vadd.f32 %v1117_v22, %v1055_v20  ;;  %v1630_v26 = vpop.f32.mrb[20].mxu0  ;;  %v986_v27 = vadd.f32 %v1627_v6, %v985_v21  ;;  %v1998_v58 = vpop.f32.mrb[20].mxu1 }
 0x10a   :  { %v473_v29 = vpop.f32.mrb[21].mxu0  ;;  %v1059_v49 = vmul.f32 %v1630_v26, %v1630_v26  ;;  %v2000_v61 = vpop.f32.mrb[21].mxu1 }
 0x10b   :  { %v987_v31 = vadd.f32 %v986_v27, %v473_v29  ;;  %v1057_v32 = vmul.f32 %v473_v29, %v473_v29  ;;  %v1119_v33 = vadd.f32 %v1118_v25, %v1056_v24  ;;  %v1631_v34 = vpop.f32.mrb[22].mxu0  ;;  %v2002_v5 = vpop.f32.mrb[22].mxu1 }
 0x10c   :  { %v1434_v37 = vpack.c.bf16 %v1631_v34, %v1630_v26  ;;  %v476_v39 = vpop.f32.mrb[23].mxu0  ;;  %v1060_v53 = vmul.f32 %v1631_v34, %v1631_v34  ;;  %v1514_v9 = vpack.c.bf16 %v2002_v5, %v1998_v58  ;;  %v2006_v10 = vpop.f32.mrb[23].mxu1 }
 0x10d   :  { %v1120_v42 = vadd.f32 %v1119_v33, %v1057_v32  ;;  %v1429_v44 = vpack.c.bf16 %v476_v39, %v473_v29  ;;  %v988_v45 = vadd.f32 %v987_v31, %v476_v39  ;;  %v1058_v46 = vmul.f32 %v476_v39, %v476_v39 }
 0x10e   :  { %1546 = vst [vmem:[%s2165_s2 + $0x58] sm:$0xff] %v1434_v37   ;;  %1562 = vst [vmem:[%s2165_s2 + $0xd8] sm:$0xff] %v1514_v9   ;;  %v1509_v18 = vpack.c.bf16 %v2006_v10, %v2000_v61 }
 0x10f   :  { %1545 = vst [vmem:[%s2165_s2 + $0x50] sm:$0xff] %v1429_v44   ;;  %v989_v50 = vadd.f32 %v1630_v26, %v988_v45  ;;  %v1121_v51 = vadd.f32 %v1120_v42, %v1058_v46 }
 0x110   :  { %1561 = vst [vmem:[%s2165_s2 + $0xd0] sm:$0xff] %v1509_v18  }
 0x111   :  { %v1122_v55 = vadd.f32 %v1121_v51, %v1059_v49  ;;  %v1634_v56 = vpop.f32.mrb[24].mxu0  ;;  %v990_v57 = vadd.f32 %v1631_v34, %v989_v50  ;;  %v2022_v29 = vpop.f32.mrb[24].mxu1 }
 0x112   :  { %v489_v60 = vpop.f32.mrb[25].mxu0  ;;  %v1063_v20 = vmul.f32 %v1634_v56, %v1634_v56  ;;  %v2024_v32 = vpop.f32.mrb[25].mxu1 }
 0x113   :  { %v991_v62 = vadd.f32 %v990_v57, %v489_v60  ;;  %v1061_v1 = vmul.f32 %v489_v60, %v489_v60  ;;  %v1123_v3 = vadd.f32 %v1122_v55, %v1060_v53  ;;  %v1635_v4 = vpop.f32.mrb[26].mxu0  ;;  %v2026_v40 = vpop.f32.mrb[26].mxu1 }
 0x114   :  { %v1444_v6 = vpack.c.bf16 %v1635_v4, %v1634_v56  ;;  %v492_v8 = vpop.f32.mrb[27].mxu0  ;;  %v1064_v24 = vmul.f32 %v1635_v4, %v1635_v4  ;;  %v1524_v45 = vpack.c.bf16 %v2026_v40, %v2022_v29  ;;  %v2030_v46 = vpop.f32.mrb[27].mxu1 }
 0x115   :  { %v1124_v13 = vadd.f32 %v1123_v3, %v1061_v1  ;;  %v1439_v15 = vpack.c.bf16 %v492_v8, %v489_v60  ;;  %v992_v16 = vadd.f32 %v991_v62, %v492_v8  ;;  %v1062_v17 = vmul.f32 %v492_v8, %v492_v8 }
 0x116   :  { %1548 = vst [vmem:[%s2165_s2 + $0x68] sm:$0xff] %v1444_v6   ;;  %1564 = vst [vmem:[%s2165_s2 + $0xe8] sm:$0xff] %v1524_v45   ;;  %v1519_v53 = vpack.c.bf16 %v2030_v46, %v2024_v32  ;;  %v1069_v3 = vmul.f32 %v1880_v54, %v1880_v54 }
 0x117   :  { %1547 = vst [vmem:[%s2165_s2 + $0x60] sm:$0xff] %v1439_v15   ;;  %v993_v21 = vadd.f32 %v1634_v56, %v992_v16  ;;  %v1125_v22 = vadd.f32 %v1124_v13, %v1062_v17 }
 0x118   :  { %1563 = vst [vmem:[%s2165_s2 + $0xe0] sm:$0xff] %v1519_v53   ;;  %v1078_v53 = vmul.f32 %v1934_v47, %v1934_v47 }
 0x119   :  { %v1126_v25 = vadd.f32 %v1125_v22, %v1063_v20  ;;  %v1638_v26 = vpop.f32.mrb[28].mxu0  ;;  %v994_v27 = vadd.f32 %v1635_v4, %v993_v21  ;;  %v2048_v4 = vpop.f32.mrb[28].mxu1  ;;  %v1070_v20 = vmul.f32 %v1886_v63, %v1886_v63 }
 0x11a   :  { %v505_v31 = vpop.f32.mrb[29].mxu0  ;;  %v1067_v55 = vmul.f32 %v1638_v26, %v1638_v26  ;;  %v2050_v6 = vpop.f32.mrb[29].mxu1 }
 0x11b   :  { %v995_v33 = vadd.f32 %v994_v27, %v505_v31  ;;  %v1065_v34 = vmul.f32 %v505_v31, %v505_v31  ;;  %v1127_v37 = vadd.f32 %v1126_v25, %v1064_v24  ;;  %v1639_v39 = vpop.f32.mrb[30].mxu0  ;;  %v2053_v13 = vpop.f32.mrb[30].mxu1  ;;  %v1073_v27 = vmul.f32 %v1904_v14, %v1904_v14 }
 0x11c   :  { %v1454_v42 = vpack.c.bf16 %v1639_v39, %v1638_v26  ;;  %v508_v44 = vpop.f32.mrb[31].mxu0  ;;  %v1068_v60 = vmul.f32 %v1639_v39, %v1639_v39  ;;  %v1534_v15 = vpack.c.bf16 %v2053_v13, %v2048_v4  ;;  %v2057_v16 = vpop.f32.mrb[31].mxu1 }
 0x11d   :  { %v1128_v48 = vadd.f32 %v1127_v37, %v1065_v34  ;;  %v1449_v49 = vpack.c.bf16 %v508_v44, %v505_v31  ;;  %v996_v50 = vadd.f32 %v995_v33, %v508_v44  ;;  %v1066_v51 = vmul.f32 %v508_v44, %v508_v44 }
 0x11e   :  { %1550 = vst [vmem:[%s2165_s2 + $0x78] sm:$0xff] %v1454_v42   ;;  %v1529_v21 = vpack.c.bf16 %v2057_v16, %v2050_v6  ;;  %1566 = vst [vmem:[%s2165_s2 + $0xf8] sm:$0xff] %v1534_v15   ;;  %v1074_v37 = vmul.f32 %v1910_v23, %v1910_v23 }
 0x11f   :  { %1549 = vst [vmem:[%s2165_s2 + $0x70] sm:$0xff] %v1449_v49   ;;  %v997_v56 = vadd.f32 %v1638_v26, %v996_v50  ;;  %v1129_v57 = vadd.f32 %v1128_v48, %v1066_v51 }
 0x120   :  { %1565 = vst [vmem:[%s2165_s2 + $0xf0] sm:$0xff] %v1529_v21  }
 0x121   :  { %v1130_v62 = vadd.f32 %v1129_v57, %v1067_v55  ;;  %v998_v1 = vadd.f32 %v1639_v39, %v997_v56  ;;  %v1075_v39 = vmul.f32 %v1902_v12, %v1902_v12 }
 0x123   :  { %v999_v8 = vadd.f32 %v998_v1, %v1880_v54  ;;  %v1131_v9 = vadd.f32 %v1130_v62, %v1068_v60  ;;  %v1071_v54 = vmul.f32 %v1878_v52, %v1878_v52 }
 0x125   :  { %v1132_v17 = vadd.f32 %v1131_v9, %v1069_v3  ;;  %v1000_v18 = vadd.f32 %v999_v8, %v1886_v63  ;;  %v1072_v63 = vmul.f32 %v1882_v59, %v1882_v59  ;;  %v1082_v8 = vmul.f32 %v1958_v11, %v1958_v11 }
 0x127   :  { %v1001_v22 = vadd.f32 %v1878_v52, %v1000_v18  ;;  %v1133_v24 = vadd.f32 %v1132_v17, %v1070_v20 }
 0x129   :  { %v1134_v25 = vadd.f32 %v1133_v24, %v1071_v54  ;;  %v1002_v26 = vadd.f32 %v1882_v59, %v1001_v22  ;;  %v1076_v59 = vmul.f32 %v1906_v19, %v1906_v19  ;;  %v1086_v22 = vmul.f32 %v1982_v41, %v1982_v41 }
 0x12b   :  { %v1003_v31 = vadd.f32 %v1002_v26, %v1904_v14  ;;  %v1135_v33 = vadd.f32 %v1134_v25, %v1072_v63  ;;  %v1077_v14 = vmul.f32 %v1928_v38, %v1928_v38 }
 0x12d   :  { %v1136_v34 = vadd.f32 %v1135_v33, %v1073_v27  ;;  %v1004_v52 = vadd.f32 %v1003_v31, %v1910_v23 }
 0x12f   :  { %v1005_v42 = vadd.f32 %v1902_v12, %v1004_v52  ;;  %v1137_v44 = vadd.f32 %v1136_v34, %v1074_v37  ;;  %v1079_v12 = vmul.f32 %v1926_v36, %v1926_v36  ;;  %v1090_v34 = vmul.f32 %v2006_v10, %v2006_v10 }
 0x131   :  { %v1138_v45 = vadd.f32 %v1137_v44, %v1075_v39  ;;  %v1006_v48 = vadd.f32 %v1906_v19, %v1005_v42  ;;  %v1080_v19 = vmul.f32 %v1930_v43, %v1930_v43 }
 0x133   :  { %v1007_v49 = vadd.f32 %v1006_v48, %v1928_v38  ;;  %v1139_v50 = vadd.f32 %v1138_v45, %v1076_v59  ;;  %v1081_v38 = vmul.f32 %v1952_v2, %v1952_v2  ;;  %v1094_v48 = vmul.f32 %v2030_v46, %v2030_v46 }
 0x135   :  { %v1140_v51 = vadd.f32 %v1139_v50, %v1077_v14  ;;  %v1008_v23 = vadd.f32 %v1007_v49, %v1934_v47 }
 0x137   :  { %v1009_v55 = vadd.f32 %v1926_v36, %v1008_v23  ;;  %v1141_v56 = vadd.f32 %v1140_v51, %v1078_v53  ;;  %v1083_v36 = vmul.f32 %v1950_v0, %v1950_v0 }
 0x139   :  { %v1142_v57 = vadd.f32 %v1141_v56, %v1079_v12  ;;  %v1010_v60 = vadd.f32 %v1930_v43, %v1009_v55  ;;  %v1084_v43 = vmul.f32 %v1954_v7, %v1954_v7  ;;  %v1098_v55 = vmul.f32 %v2057_v16, %v2057_v16 }
 0x13b   :  { %v1011_v62 = vadd.f32 %v1010_v60, %v1952_v2  ;;  %v1143_v1 = vadd.f32 %v1142_v57, %v1080_v19  ;;  %v1085_v2 = vmul.f32 %v1976_v30, %v1976_v30 }
 0x13d   :  { %v1144_v3 = vadd.f32 %v1143_v1, %v1081_v38  ;;  %v1012_v47 = vadd.f32 %v1011_v62, %v1958_v11 }
 0x13f   :  { %v1013_v9 = vadd.f32 %v1950_v0, %v1012_v47  ;;  %v1145_v15 = vadd.f32 %v1144_v3, %v1082_v8  ;;  %v1087_v0 = vmul.f32 %v1974_v28, %v1974_v28 }
 0x141   :  { %v1146_v17 = vadd.f32 %v1145_v15, %v1083_v36  ;;  %v1014_v18 = vadd.f32 %v1954_v7, %v1013_v9  ;;  %v1088_v7 = vmul.f32 %v1978_v35, %v1978_v35 }
 0x143   :  { %v1015_v20 = vadd.f32 %v1014_v18, %v1976_v30  ;;  %v1147_v21 = vadd.f32 %v1146_v17, %v1084_v43  ;;  %v1089_v30 = vmul.f32 %v2000_v61, %v2000_v61 }
 0x145   :  { %v1148_v54 = vadd.f32 %v1147_v21, %v1085_v2  ;;  %v1016_v11 = vadd.f32 %v1015_v20, %v1982_v41 }
 0x147   :  { %v1017_v24 = vadd.f32 %v1974_v28, %v1016_v11  ;;  %v1149_v63 = vadd.f32 %v1148_v54, %v1086_v22  ;;  %v1091_v28 = vmul.f32 %v1998_v58, %v1998_v58 }
 0x149   :  { %v1150_v25 = vadd.f32 %v1149_v63, %v1087_v0  ;;  %v1018_v26 = vadd.f32 %v1978_v35, %v1017_v24  ;;  %v1092_v35 = vmul.f32 %v2002_v5, %v2002_v5 }
 0x14b   :  { %v1019_v27 = vadd.f32 %v1018_v26, %v2000_v61  ;;  %v1151_v31 = vadd.f32 %v1150_v25, %v1088_v7  ;;  %v1093_v61 = vmul.f32 %v2024_v32, %v2024_v32 }
 0x14d   :  { %v1152_v33 = vadd.f32 %v1151_v31, %v1089_v30  ;;  %v1020_v41 = vadd.f32 %v1019_v27, %v2006_v10 }
 0x14f   :  { %v1021_v52 = vadd.f32 %v1998_v58, %v1020_v41  ;;  %v1153_v37 = vadd.f32 %v1152_v33, %v1090_v34  ;;  %v1095_v58 = vmul.f32 %v2022_v29, %v2022_v29 }
 0x151   :  { %v1154_v39 = vadd.f32 %v1153_v37, %v1091_v28  ;;  %v1022_v42 = vadd.f32 %v2002_v5, %v1021_v52  ;;  %v1096_v5 = vmul.f32 %v2026_v40, %v2026_v40 }
 0x153   :  { %v1023_v44 = vadd.f32 %v1022_v42, %v2024_v32  ;;  %v1155_v59 = vadd.f32 %v1154_v39, %v1092_v35  ;;  %v1097_v32 = vmul.f32 %v2050_v6, %v2050_v6 }
 0x155   :  { %v1156_v45 = vadd.f32 %v1155_v59, %v1093_v61  ;;  %v1024_v10 = vadd.f32 %v1023_v44, %v2030_v46 }
 0x157   :  { %v1025_v14 = vadd.f32 %v2022_v29, %v1024_v10  ;;  %v1157_v49 = vadd.f32 %v1156_v45, %v1094_v48  ;;  %v1099_v29 = vmul.f32 %v2048_v4, %v2048_v4 }
 0x159   :  { %v1158_v50 = vadd.f32 %v1157_v49, %v1095_v58  ;;  %v1026_v51 = vadd.f32 %v2026_v40, %v1025_v14  ;;  %v1100_v40 = vmul.f32 %v2053_v13, %v2053_v13 }
 0x15b   :  { %v1027_v23 = vadd.f32 %v1026_v51, %v2050_v6  ;;  %v1159_v53 = vadd.f32 %v1158_v50, %v1096_v5 }
 0x15d   :  { %v1160_v12 = vadd.f32 %v1159_v53, %v1097_v32  ;;  %v1028_v46 = vadd.f32 %v1027_v23, %v2057_v16 }
 0x15f   :  { %v1029_v56 = vadd.f32 %v2048_v4, %v1028_v46  ;;  %v1161_v19 = vadd.f32 %v1160_v12, %v1098_v55 }
 0x161   :  { %v1030_v57 = vadd.f32 %v2053_v13, %v1029_v56  ;;  %v1162_v60 = vadd.f32 %v1161_v19, %v1099_v29 }
 0x163   :  { %v1031_v6 = vrot.slane %v1030_v57, 4  ;;  %v1163_v38 = vadd.f32 %v1162_v60, %v1100_v40 }
 0x165   :  { %v1032_v62 = vadd.f32 %v1031_v6, %v1030_v57  ;;  %v1164_v1 = vrot.slane %v1163_v38, 4 }
 0x167   :  { %v1033_v3 = vrot.slane %v1032_v62, 2  ;;  %v1165_v47 = vadd.f32 %v1164_v1, %v1163_v38 }
 0x169   :  { %v1034_v8 = vadd.f32 %v1033_v3, %v1032_v62  ;;  %v1166_v16 = vrot.slane %v1165_v47, 2 }
 0x16b   :  { %v1035_v36 = vrot.slane %v1034_v8, 1  ;;  %v1167_v9 = vadd.f32 %v1166_v16, %v1165_v47 }
 0x16d   :  { %v1168_v15 = vrot.slane %v1167_v9, 1  ;;  %v1036_v4 = vadd.f32 %v1035_v36, %v1034_v8 }
 0x16f   :  { %v1169_v43 = vadd.f32 %v1168_v15, %v1167_v9 }
 0x171   :  { %v1171_v17 = vsel %vm1170_vm2, %v1036_v4, %v1169_v43 }
 0x172   :  { %1172 = vst [vmem:[%s2166_s3] sm:$0x3] %v1171_v17 }

// kernel: encoder_forward.9
= control target key start
LH: loop header
LB: loop body
LE: loop exit
PB: predicated region body
PF: predicated region fallthrough
CT: control target
= control target key end

     0   :  { %s299_s0 = inlined_call_operand.vmem [shape: bf16[4,32,128], index: 0, kind: input, shape index: {}]   ;;  %s300_s1 = inlined_call_operand.vmem [shape: f32[2,128], index: 1, kind: input, shape index: {}]   ;;  %s301_s2 = inlined_call_operand.vmem [shape: bf16[32,128], index: 2, kind: output, shape index: {}]  }
   0x1   :  { %v230_v0 = vld [vmem:[%s300_s1] ss:$0 sm:$0xff]  ;;  %v205_v4 = vld [vmem:[%s299_s0 + $0x10] sm:$0xff]   ;;  %v247_v7 = vld [vmem:[%s300_s1 + $0x1] ss:$0 sm:$0xff] }
   0x2   :  { %v163_v1 = vld [vmem:[%s299_s0] sm:$0xff]   ;;  %v209_v6 = vld [vmem:[%s299_s0 + $0x30] sm:$0xff]   ;;  %v172_v8 = vunpack.c.l.bf16 %v205_v4  ;;  %v173_v9 = vunpack.c.h.bf16 %v205_v4  ;;  %v204_v28 = vld [vmem:[%s299_s0 + $0x8] sm:$0xff]  }
   0x3   :  { %v164_v2 = vunpack.c.l.bf16 %v163_v1  ;;  %v165_v3 = vunpack.c.h.bf16 %v163_v1  ;;  %v207_v5 = vld [vmem:[%s299_s0 + $0x20] sm:$0xff]   ;;  %v188_v14 = vunpack.c.l.bf16 %v209_v6  ;;  %v189_v15 = vunpack.c.h.bf16 %v209_v6  ;;  %v206_v33 = vld [vmem:[%s299_s0 + $0x18] sm:$0xff]   ;;  %v208_v38 = vld [vmem:[%s299_s0 + $0x28] sm:$0xff]  }
   0x4   :  { %v180_v10 = vunpack.c.l.bf16 %v207_v5  ;;  %v181_v11 = vunpack.c.h.bf16 %v207_v5  ;;  %v50_v16 = vmul.f32 %v172_v8, %v230_v0  ;;  %v51_v17 = vmul.f32 %v173_v9, %v230_v0  ;;  %v210_v59 = vld [vmem:[%s299_s0 + $0x38] sm:$0xff]  }
   0x5   :  { %v25_v12 = vmul.f32 %v164_v2, %v230_v0  ;;  %v26_v13 = vmul.f32 %v165_v3, %v230_v0  ;;  %v100_v22 = vmul.f32 %v188_v14, %v230_v0  ;;  %v101_v23 = vmul.f32 %v189_v15, %v230_v0 }
   0x6   :  { %v75_v18 = vmul.f32 %v180_v10, %v230_v0  ;;  %v76_v19 = vmul.f32 %v181_v11, %v230_v0  ;;  %v54_v24 = vadd.f32 %v247_v7, %v50_v16  ;;  %v55_v25 = vadd.f32 %v247_v7, %v51_v17 }
   0x7   :  { %v33_v20 = vadd.f32 %v247_v7, %v25_v12  ;;  %v34_v21 = vadd.f32 %v247_v7, %v26_v13  ;;  %v104_v31 = vadd.f32 %v247_v7, %v100_v22  ;;  %v105_v32 = vadd.f32 %v247_v7, %v101_v23 }
   0x8   :  { %v79_v26 = vadd.f32 %v247_v7, %v75_v18  ;;  %v80_v27 = vadd.f32 %v247_v7, %v76_v19  ;;  %v58_v34 = vmax.f32 %v54_v24, 0.0  ;;  %v59_v35 = vmax.f32 %v55_v25, 0.0 }
   0x9   :  { %v37_v29 = vmax.f32 %v33_v20, 0.0  ;;  %v38_v30 = vmax.f32 %v34_v21, 0.0  ;;  %v108_v39 = vmax.f32 %v104_v31, 0.0  ;;  %v109_v40 = vmax.f32 %v105_v32, 0.0 }
   0xa   :  { %v83_v36 = vmax.f32 %v79_v26, 0.0  ;;  %v84_v37 = vmax.f32 %v80_v27, 0.0  ;;  %v168_v41 = vunpack.c.l.bf16 %v204_v28  ;;  %v169_v42 = vunpack.c.h.bf16 %v204_v28 }
   0xb   :  { %v62_v43 = vadd.f32 %v58_v34, %v37_v29  ;;  %v63_v44 = vadd.f32 %v59_v35, %v38_v30  ;;  %v176_v45 = vunpack.c.l.bf16 %v206_v33  ;;  %v177_v46 = vunpack.c.h.bf16 %v206_v33 }
   0xc   :  { %v27_v47 = vmul.f32 %v168_v41, %v230_v0  ;;  %v28_v48 = vmul.f32 %v169_v42, %v230_v0  ;;  %v184_v49 = vunpack.c.l.bf16 %v208_v38  ;;  %v185_v50 = vunpack.c.h.bf16 %v208_v38 }
   0xd   :  { %v87_v51 = vadd.f32 %v83_v36, %v62_v43  ;;  %v88_v52 = vadd.f32 %v84_v37, %v63_v44  ;;  %v52_v53 = vmul.f32 %v176_v45, %v230_v0  ;;  %v53_v54 = vmul.f32 %v177_v46, %v230_v0 }
   0xe   :  { %v35_v55 = vadd.f32 %v247_v7, %v27_v47  ;;  %v36_v56 = vadd.f32 %v247_v7, %v28_v48  ;;  %v77_v57 = vmul.f32 %v184_v49, %v230_v0  ;;  %v78_v58 = vmul.f32 %v185_v50, %v230_v0 }
   0xf   :  { %v112_v60 = vadd.f32 %v108_v39, %v87_v51  ;;  %v113_v61 = vadd.f32 %v109_v40, %v88_v52  ;;  %v56_v62 = vadd.f32 %v247_v7, %v52_v53  ;;  %v57_v63 = vadd.f32 %v247_v7, %v53_v54 }
  0x10   :  { %v39_v1 = vmax.f32 %v35_v55, 0.0  ;;  %v40_v2 = vmax.f32 %v36_v56, 0.0  ;;  %v81_v3 = vadd.f32 %v247_v7, %v77_v57  ;;  %v82_v4 = vadd.f32 %v247_v7, %v78_v58 }
  0x11   :  { %v197_v5 = vpack.c.bf16 %v113_v61, %v112_v60  ;;  %v60_v6 = vmax.f32 %v56_v62, 0.0  ;;  %v61_v8 = vmax.f32 %v57_v63, 0.0  ;;  %v192_v9 = vunpack.c.l.bf16 %v210_v59 }
  0x12   :  { %v85_v10 = vmax.f32 %v81_v3, 0.0  ;;  %v86_v11 = vmax.f32 %v82_v4, 0.0  ;;  %v193_v12 = vunpack.c.h.bf16 %v210_v59 }
  0x13   :  { %198 = vst [vmem:[%s301_s2] sm:$0xff] %v197_v5   ;;  %v64_v13 = vadd.f32 %v60_v6, %v39_v1  ;;  %v65_v14 = vadd.f32 %v61_v8, %v40_v2  ;;  %v102_v15 = vmul.f32 %v192_v9, %v230_v0 }
  0x14   :  { %v103_v16 = vmul.f32 %v193_v12, %v230_v0 }
  0x15   :  { %v89_v17 = vadd.f32 %v85_v10, %v64_v13  ;;  %v106_v18 = vadd.f32 %v247_v7, %v102_v15  ;;  %v90_v19 = vadd.f32 %v86_v11, %v65_v14 }
  0x16   :  { %v107_v20 = vadd.f32 %v247_v7, %v103_v16 }
  0x17   :  { %v110_v21 = vmax.f32 %v106_v18, 0.0 }
  0x18   :  { %v111_v22 = vmax.f32 %v107_v20, 0.0 }
  0x19   :  { %v114_v23 = vadd.f32 %v110_v21, %v89_v17 }
  0x1a   :  { %v115_v24 = vadd.f32 %v111_v22, %v90_v19 }
  0x1c   :  { %v202_v25 = vpack.c.bf16 %v115_v24, %v114_v23 }
  0x1e   :  { %211 = vst [vmem:[%s301_s2 + $0x8] sm:$0xff] %v202_v25  }

// kernel: encoder_forward.8
= control target key start
LH: loop header
LB: loop body
LE: loop exit
PB: predicated region body
PF: predicated region fallthrough
CT: control target
= control target key end

     0   :  { %v609_v0 = vmov 0   ;;  %vm174_vm0 = vcmask 130048   ;;  %vm434_vm1 = vcmask 1040384   ;;  %s752_s1 = inlined_call_operand.vmem [shape: bf16[144,128], index: 1, kind: input, shape index: {}]   ;;  %s753_s0 = inlined_call_operand.vmem [shape: bf16[4,32,144], index: 0, kind: input, shape index: {}]   ;;  %s754_s2 = inlined_call_operand.vmem [shape: bf16[4,32,128], index: 2, kind: output, shape index: {0}]   ;;  %s755_s3 = inlined_call_operand.vmem [shape: f32[1,2,128], index: 3, kind: output, shape index: {1}]  }
   0x1   :  { %199 = vmatprep.subr.bf16.mxu0 %v609_v0  ;;  %v576_v1 = vld [vmem:[%s752_s1] sm:$0xff]   ;;  %557 = vmatprep.subr.bf16.mxu1 %v609_v0  ;;  %v577_v2 = vld [vmem:[%s752_s1 + $0x8] sm:$0xff]   ;;  %v578_v3 = vld [vmem:[%s752_s1 + $0x10] sm:$0xff]  }
   0x2   :  { %200 = vmatpush1.bf16.msra.mxu0 %v576_v1  ;;  %566 = vmatpush1.bf16.msra.mxu1 %v576_v1  ;;  %v579_v4 = vld [vmem:[%s752_s1 + $0x18] sm:$0xff]   ;;  %v587_v5 = vld [vmem:[%s753_s0 + $0x4] ss:$8 sps:$4 sm:$0xff]   ;;  %v582_v9 = vld [vmem:[%s752_s1 + $0x30] sm:$0xff]  }
   0x3   :  { %201 = vmatprep.subr.bf16.mxu0 %v609_v0  ;;  %558 = vmatprep.subr.bf16.mxu1 %v609_v0  ;;  %v593_v6 = vld [vmem:[%s753_s0 + $0x44] ss:$8 sps:$4 sm:$0xff]   ;;  %v583_v10 = vld [vmem:[%s752_s1 + $0x38] sm:$0xff]   ;;  %v585_v12 = vld [vmem:[%s753_s0] ss:$8 sps:$4 sm:$0xff]  }
   0x4   :  { %470 = vmatprep.mubr.msk.bf16.mxu0 %vm174_vm0, %v587_v5  ;;  %v580_v7 = vld [vmem:[%s752_s1 + $0x20] sm:$0xff]   ;;  %474 = vmatprep.mubr.msk.bf16.mxu1 %vm174_vm0, %v593_v6  ;;  %v581_v8 = vld [vmem:[%s752_s1 + $0x28] sm:$0xff]   ;;  %v588_v14 = vld [vmem:[%s753_s0 + $0x14] ss:$8 sps:$4 sm:$0xff]  }
   0x5   :  { %v584_v11 = vld [vmem:[%s752_s1 + $0x40] sm:$0xff]   ;;  %v597_v15 = vld [vmem:[%s753_s0 + $0x54] ss:$8 sps:$4 sm:$0xff]   ;;  %v590_v16 = vld [vmem:[%s753_s0 + $0x10] ss:$8 sps:$4 sm:$0xff]  }
   0x6   :  { %202 = vmatpush1.bf16.msra.mxu0 %v577_v2  ;;  %567 = vmatpush1.bf16.msra.mxu1 %v577_v2  ;;  %v591_v13 = vld [vmem:[%s753_s0 + $0x40] ss:$8 sps:$4 sm:$0xff]   ;;  %v599_v17 = vld [vmem:[%s753_s0 + $0x50] ss:$8 sps:$4 sm:$0xff]   ;;  %v594_v18 = vld [vmem:[%s753_s0 + $0x24] ss:$8 sps:$4 sm:$0xff]  }
   0x7   :  { %203 = vmatprep.subr.bf16.mxu0 %v609_v0  ;;  %559 = vmatprep.subr.bf16.mxu1 %v609_v0  ;;  %v603_v19 = vld [vmem:[%s753_s0 + $0x64] ss:$8 sps:$4 sm:$0xff]   ;;  %v596_v20 = vld [vmem:[%s753_s0 + $0x20] ss:$8 sps:$4 sm:$0xff]   ;;  %v600_v22 = vld [vmem:[%s753_s0 + $0x34] ss:$8 sps:$4 sm:$0xff]  }
   0x8   :  { %v605_v21 = vld [vmem:[%s753_s0 + $0x60] ss:$8 sps:$4 sm:$0xff]   ;;  %v606_v23 = vld [vmem:[%s753_s0 + $0x74] ss:$8 sps:$4 sm:$0xff]   ;;  %v602_v24 = vld [vmem:[%s753_s0 + $0x30] ss:$8 sps:$4 sm:$0xff]  }
   0x9   :  { %v608_v25 = vld [vmem:[%s753_s0 + $0x70] ss:$8 sps:$4 sm:$0xff]  }
   0xa   :  { %204 = vmatpush1.bf16.msra.mxu0 %v578_v3  ;;  %568 = vmatpush1.bf16.msra.mxu1 %v578_v3 }
   0xb   :  { %205 = vmatprep.subr.bf16.mxu0 %v609_v0  ;;  %560 = vmatprep.subr.bf16.mxu1 %v609_v0 }
   0xe   :  { %206 = vmatpush1.bf16.msra.mxu0 %v579_v4  ;;  %569 = vmatpush1.bf16.msra.mxu1 %v579_v4 }
   0xf   :  { %207 = vmatprep.subr.bf16.mxu0 %v609_v0  ;;  %561 = vmatprep.subr.bf16.mxu1 %v609_v0 }
  0x12   :  { %208 = vmatpush1.bf16.msra.mxu0 %v580_v7  ;;  %570 = vmatpush1.bf16.msra.mxu1 %v580_v7 }
  0x13   :  { %209 = vmatprep.subr.bf16.mxu0 %v609_v0  ;;  %562 = vmatprep.subr.bf16.mxu1 %v609_v0 }
  0x16   :  { %210 = vmatpush1.bf16.msra.mxu0 %v581_v8  ;;  %571 = vmatpush1.bf16.msra.mxu1 %v581_v8 }
  0x17   :  { %211 = vmatprep.subr.bf16.mxu0 %v609_v0  ;;  %563 = vmatprep.subr.bf16.mxu1 %v609_v0 }
  0x1a   :  { %212 = vmatpush1.bf16.msra.mxu0 %v582_v9  ;;  %572 = vmatpush1.bf16.msra.mxu1 %v582_v9 }
  0x1b   :  { %213 = vmatprep.subr.bf16.mxu0 %v609_v0  ;;  %564 = vmatprep.subr.bf16.mxu1 %v609_v0 }
  0x1e   :  { %214 = vmatpush1.bf16.msra.mxu0 %v583_v10  ;;  %573 = vmatpush1.bf16.msra.mxu1 %v583_v10 }
  0x1f   :  { %215 = vmatprep.subr.bf16.mxu0 %v609_v0  ;;  %565 = vmatprep.subr.bf16.mxu1 %v609_v0 }
  0x22   :  { %216 = vmatpush1.bf16.msra.mxu0 %v584_v11  ;;  %574 = vmatpush1.bf16.msra.mxu1 %v584_v11 }
  0x25   :  { %232 = vmatmul.mubr.bf16.vlgmr.msra.gmra.mrb[0].mxu0 %v585_v12  ;;  %264 = vmatmul.mubr.bf16.vlgmr.msra.gmra.mrb[0].mxu1 %v591_v13 }
  0x26   :  { %471 = vmatprep.mubr.msk.bf16.mxu0 %vm174_vm0, %v588_v14  ;;  %475 = vmatprep.mubr.msk.bf16.mxu1 %vm174_vm0, %v597_v15 }
  0x2d   :  { %240 = vmatmul.mubr.bf16.gmra.mrb[4].mxu0 %v590_v16  ;;  %272 = vmatmul.mubr.bf16.gmra.mrb[4].mxu1 %v599_v17 }
  0x2e   :  { %472 = vmatprep.mubr.msk.bf16.mxu0 %vm174_vm0, %v594_v18  ;;  %476 = vmatprep.mubr.msk.bf16.mxu1 %vm174_vm0, %v603_v19 }
  0x35   :  { %248 = vmatmul.mubr.bf16.gmra.mrb[8].mxu0 %v596_v20  ;;  %280 = vmatmul.mubr.bf16.gmra.mrb[8].mxu1 %v605_v21 }
  0x36   :  { %473 = vmatprep.mubr.msk.bf16.mxu0 %vm174_vm0, %v600_v22  ;;  %477 = vmatprep.mubr.msk.bf16.mxu1 %vm174_vm0, %v606_v23 }
  0x3d   :  { %256 = vmatmul.mubr.bf16.gmra.mrb[12].mxu0 %v602_v24  ;;  %288 = vmatmul.mubr.bf16.gmra.mrb[12].mxu1 %v608_v25 }
  0xf8   :  { %v233_v26 = vpop.f32.mrb[0].mxu0  ;;  %v713_v27 = vpop.f32.mrb[0].mxu1 }
  0xf9   :  { %v235_v28 = vpop.f32.mrb[1].mxu0  ;;  %v267_v29 = vpop.f32.mrb[1].mxu1  ;;  %v397_v30 = vmul.f32 %v233_v26, %v233_v26  ;;  %v405_v23 = vmul.f32 %v713_v27, %v713_v27 }
  0xfa   :  { %v236_v31 = vpop.f32.mrb[2].mxu0  ;;  %v715_v32 = vpop.f32.mrb[2].mxu1 }
  0xfb   :  { %v513_v33 = vpack.c.bf16 %v236_v31, %v233_v26  ;;  %v376_v34 = vadd.f32 %v236_v31, %v233_v26  ;;  %v398_v35 = vmul.f32 %v236_v31, %v236_v31  ;;  %v238_v36 = vpop.f32.mrb[3].mxu0  ;;  %v533_v37 = vpack.c.bf16 %v715_v32, %v713_v27  ;;  %v270_v38 = vpop.f32.mrb[3].mxu1 }
  0xfc   :  { %v406_v26 = vmul.f32 %v715_v32, %v715_v32 }
  0xfd   :  { %514 = vst [vmem:[%s754_s2] sm:$0xff] %v513_v33   ;;  %v413_v39 = vadd.f32 %v398_v35, %v397_v30  ;;  %553 = vst [vmem:[%s754_s2 + $0x20] sm:$0xff] %v533_v37  }
 0x100   :  { %v241_v40 = vpop.f32.mrb[4].mxu0  ;;  %v273_v41 = vpop.f32.mrb[4].mxu1 }
 0x101   :  { %v377_v42 = vadd.f32 %v376_v34, %v241_v40  ;;  %v399_v43 = vmul.f32 %v241_v40, %v241_v40  ;;  %v243_v44 = vpop.f32.mrb[5].mxu0  ;;  %v275_v45 = vpop.f32.mrb[5].mxu1  ;;  %v407_v30 = vmul.f32 %v273_v41, %v273_v41 }
 0x102   :  { %v244_v46 = vpop.f32.mrb[6].mxu0  ;;  %v276_v47 = vpop.f32.mrb[6].mxu1 }
 0x103   :  { %v414_v48 = vadd.f32 %v413_v39, %v399_v43  ;;  %v518_v49 = vpack.c.bf16 %v244_v46, %v241_v40  ;;  %v378_v50 = vadd.f32 %v377_v42, %v244_v46  ;;  %v400_v51 = vmul.f32 %v244_v46, %v244_v46  ;;  %v246_v52 = vpop.f32.mrb[7].mxu0  ;;  %v278_v53 = vpop.f32.mrb[7].mxu1 }
 0x104   :  { %v538_v54 = vpack.c.bf16 %v276_v47, %v273_v41  ;;  %v408_v34 = vmul.f32 %v276_v47, %v276_v47 }
 0x105   :  { %550 = vst [vmem:[%s754_s2 + $0x8] sm:$0xff] %v518_v49   ;;  %v415_v55 = vadd.f32 %v414_v48, %v400_v51 }
 0x106   :  { %554 = vst [vmem:[%s754_s2 + $0x28] sm:$0xff] %v538_v54  }
 0x108   :  { %v249_v56 = vpop.f32.mrb[8].mxu0  ;;  %v281_v57 = vpop.f32.mrb[8].mxu1 }
 0x109   :  { %v379_v58 = vadd.f32 %v378_v50, %v249_v56  ;;  %v401_v59 = vmul.f32 %v249_v56, %v249_v56  ;;  %v251_v60 = vpop.f32.mrb[9].mxu0  ;;  %v283_v61 = vpop.f32.mrb[9].mxu1  ;;  %v409_v38 = vmul.f32 %v281_v57, %v281_v57 }
 0x10a   :  { %v252_v62 = vpop.f32.mrb[10].mxu0  ;;  %v284_v63 = vpop.f32.mrb[10].mxu1 }
 0x10b   :  { %v416_v0 = vadd.f32 %v415_v55, %v401_v59  ;;  %v523_v1 = vpack.c.bf16 %v252_v62, %v249_v56  ;;  %v380_v2 = vadd.f32 %v379_v58, %v252_v62  ;;  %v402_v3 = vmul.f32 %v252_v62, %v252_v62  ;;  %v254_v4 = vpop.f32.mrb[11].mxu0  ;;  %v286_v5 = vpop.f32.mrb[11].mxu1 }
 0x10c   :  { %v543_v6 = vpack.c.bf16 %v284_v63, %v281_v57  ;;  %v410_v42 = vmul.f32 %v284_v63, %v284_v63 }
 0x10d   :  { %551 = vst [vmem:[%s754_s2 + $0x10] sm:$0xff] %v523_v1   ;;  %v417_v7 = vadd.f32 %v416_v0, %v402_v3 }
 0x10e   :  { %555 = vst [vmem:[%s754_s2 + $0x30] sm:$0xff] %v543_v6  }
 0x110   :  { %v257_v8 = vpop.f32.mrb[12].mxu0  ;;  %v289_v9 = vpop.f32.mrb[12].mxu1 }
 0x111   :  { %v381_v10 = vadd.f32 %v380_v2, %v257_v8  ;;  %v403_v11 = vmul.f32 %v257_v8, %v257_v8  ;;  %v259_v12 = vpop.f32.mrb[13].mxu0  ;;  %v291_v13 = vpop.f32.mrb[13].mxu1  ;;  %v411_v43 = vmul.f32 %v289_v9, %v289_v9 }
 0x112   :  { %v260_v14 = vpop.f32.mrb[14].mxu0  ;;  %v292_v15 = vpop.f32.mrb[14].mxu1 }
 0x113   :  { %v418_v16 = vadd.f32 %v417_v7, %v403_v11  ;;  %v528_v17 = vpack.c.bf16 %v260_v14, %v257_v8  ;;  %v382_v18 = vadd.f32 %v381_v10, %v260_v14  ;;  %v404_v19 = vmul.f32 %v260_v14, %v260_v14  ;;  %v262_v20 = vpop.f32.mrb[15].mxu0  ;;  %v294_v21 = vpop.f32.mrb[15].mxu1 }
 0x114   :  { %v548_v22 = vpack.c.bf16 %v292_v15, %v289_v9  ;;  %v412_v49 = vmul.f32 %v292_v15, %v292_v15 }
 0x115   :  { %552 = vst [vmem:[%s754_s2 + $0x18] sm:$0xff] %v528_v17   ;;  %v383_v24 = vadd.f32 %v382_v18, %v713_v27  ;;  %v419_v25 = vadd.f32 %v418_v16, %v404_v19 }
 0x116   :  { %556 = vst [vmem:[%s754_s2 + $0x38] sm:$0xff] %v548_v22  }
 0x117   :  { %v384_v28 = vadd.f32 %v383_v24, %v715_v32  ;;  %v420_v29 = vadd.f32 %v419_v25, %v405_v23 }
 0x119   :  { %v421_v31 = vadd.f32 %v420_v29, %v406_v26  ;;  %v385_v33 = vadd.f32 %v384_v28, %v273_v41 }
 0x11b   :  { %v386_v35 = vadd.f32 %v385_v33, %v276_v47  ;;  %v422_v36 = vadd.f32 %v421_v31, %v407_v30 }
 0x11d   :  { %v387_v37 = vadd.f32 %v386_v35, %v281_v57  ;;  %v423_v27 = vadd.f32 %v422_v36, %v408_v34 }
 0x11f   :  { %v424_v39 = vadd.f32 %v423_v27, %v409_v38  ;;  %v388_v40 = vadd.f32 %v387_v37, %v284_v63 }
 0x121   :  { %v425_v44 = vadd.f32 %v424_v39, %v410_v42  ;;  %v389_v45 = vadd.f32 %v388_v40, %v289_v9 }
 0x123   :  { %v426_v46 = vadd.f32 %v425_v44, %v411_v43  ;;  %v390_v48 = vadd.f32 %v389_v45, %v292_v15 }
 0x125   :  { %v391_v32 = vrot.slane %v390_v48, 4  ;;  %v427_v50 = vadd.f32 %v426_v46, %v412_v49 }
 0x127   :  { %v392_v51 = vadd.f32 %v391_v32, %v390_v48  ;;  %v428_v52 = vrot.slane %v427_v50, 4 }
 0x129   :  { %v393_v41 = vrot.slane %v392_v51, 2  ;;  %v429_v53 = vadd.f32 %v428_v52, %v427_v50 }
 0x12b   :  { %v394_v47 = vadd.f32 %v393_v41, %v392_v51  ;;  %v430_v54 = vrot.slane %v429_v53, 2 }
 0x12d   :  { %v395_v55 = vrot.slane %v394_v47, 1  ;;  %v431_v56 = vadd.f32 %v430_v54, %v429_v53 }
 0x12f   :  { %v432_v57 = vrot.slane %v431_v56, 1  ;;  %v396_v58 = vadd.f32 %v395_v55, %v394_v47 }
 0x131   :  { %v433_v59 = vadd.f32 %v432_v57, %v431_v56 }
 0x133   :  { %v435_v60 = vsel %vm434_vm1, %v396_v58, %v433_v59 }
 0x134   :  { %436 = vst [vmem:[%s755_s3] sm:$0x3] %v435_v60 }

// kernel: encoder_forward.11
= control target key start
LH: loop header
LB: loop body
LE: loop exit
PB: predicated region body
PF: predicated region fallthrough
CT: control target
= control target key end

     0   :  { %s156_s0 = inlined_call_operand.vmem [shape: bf16[4,16,128], index: 0, kind: input, shape index: {}]   ;;  %s157_s1 = inlined_call_operand.vmem [shape: f32[2,128], index: 1, kind: input, shape index: {}]   ;;  %s158_s2 = inlined_call_operand.vmem [shape: bf16[16,128], index: 2, kind: output, shape index: {}]  }
   0x1   :  { %v84_v0 = vld [vmem:[%s157_s1] ss:$0 sm:$0xff]  ;;  %v117_v4 = vld [vmem:[%s156_s0 + $0x8] sm:$0xff]   ;;  %v118_v5 = vld [vmem:[%s156_s0 + $0x10] sm:$0xff]  }
   0x2   :  { %v97_v1 = vld [vmem:[%s156_s0] sm:$0xff]   ;;  %v119_v6 = vld [vmem:[%s156_s0 + $0x18] sm:$0xff]   ;;  %v102_v8 = vunpack.c.l.bf16 %v117_v4  ;;  %v103_v9 = vunpack.c.h.bf16 %v117_v4  ;;  %v106_v10 = vunpack.c.l.bf16 %v118_v5  ;;  %v107_v11 = vunpack.c.h.bf16 %v118_v5 }
   0x3   :  { %v98_v2 = vunpack.c.l.bf16 %v97_v1  ;;  %v99_v3 = vunpack.c.h.bf16 %v97_v1  ;;  %v85_v7 = vld [vmem:[%s157_s1 + $0x1] ss:$0 sm:$0xff]  ;;  %v110_v14 = vunpack.c.l.bf16 %v119_v6  ;;  %v111_v15 = vunpack.c.h.bf16 %v119_v6 }
   0x4   :  { %v36_v16 = vmul.f32 %v102_v8, %v84_v0  ;;  %v37_v17 = vmul.f32 %v103_v9, %v84_v0  ;;  %v49_v18 = vmul.f32 %v106_v10, %v84_v0  ;;  %v50_v19 = vmul.f32 %v107_v11, %v84_v0 }
   0x5   :  { %v21_v12 = vmul.f32 %v98_v2, %v84_v0  ;;  %v22_v13 = vmul.f32 %v99_v3, %v84_v0  ;;  %v62_v22 = vmul.f32 %v110_v14, %v84_v0  ;;  %v63_v23 = vmul.f32 %v111_v15, %v84_v0 }
   0x6   :  { %v38_v24 = vadd.f32 %v85_v7, %v36_v16  ;;  %v39_v25 = vadd.f32 %v85_v7, %v37_v17  ;;  %v51_v26 = vadd.f32 %v85_v7, %v49_v18  ;;  %v52_v27 = vadd.f32 %v85_v7, %v50_v19 }
   0x7   :  { %v27_v20 = vadd.f32 %v85_v7, %v21_v12  ;;  %v28_v21 = vadd.f32 %v85_v7, %v22_v13  ;;  %v64_v30 = vadd.f32 %v85_v7, %v62_v22  ;;  %v65_v31 = vadd.f32 %v85_v7, %v63_v23 }
   0x8   :  { %v40_v32 = vmax.f32 %v38_v24, 0.0  ;;  %v41_v33 = vmax.f32 %v39_v25, 0.0  ;;  %v53_v34 = vmax.f32 %v51_v26, 0.0  ;;  %v54_v35 = vmax.f32 %v52_v27, 0.0 }
   0x9   :  { %v29_v28 = vmax.f32 %v27_v20, 0.0  ;;  %v30_v29 = vmax.f32 %v28_v21, 0.0  ;;  %v66_v38 = vmax.f32 %v64_v30, 0.0  ;;  %v67_v39 = vmax.f32 %v65_v31, 0.0 }
   0xb   :  { %v42_v36 = vadd.f32 %v40_v32, %v29_v28  ;;  %v43_v37 = vadd.f32 %v41_v33, %v30_v29 }
   0xd   :  { %v55_v40 = vadd.f32 %v53_v34, %v42_v36  ;;  %v56_v41 = vadd.f32 %v54_v35, %v43_v37 }
   0xf   :  { %v68_v42 = vadd.f32 %v66_v38, %v55_v40  ;;  %v69_v43 = vadd.f32 %v67_v39, %v56_v41 }
  0x11   :  { %v115_v44 = vpack.c.bf16 %v69_v43, %v68_v42 }
  0x13   :  { %116 = vst [vmem:[%s158_s2] sm:$0xff] %v115_v44  }

// kernel: encoder_forward.10
= control target key start
LH: loop header
LB: loop body
LE: loop exit
PB: predicated region body
PF: predicated region fallthrough
CT: control target
= control target key end

     0   :  { %vm234_vm0 = vcmask 261120   ;;  %vm451_vm1 = vcmask 1040384   ;;  %s772_s1 = inlined_call_operand.vmem [shape: bf16[288,128], index: 1, kind: input, shape index: {}]   ;;  %s773_s0 = inlined_call_operand.vmem [shape: bf16[4,16,288], index: 0, kind: input, shape index: {}]   ;;  %s774_s2 = inlined_call_operand.vmem [shape: bf16[4,16,128], index: 2, kind: output, shape index: {0}]   ;;  %s775_s3 = inlined_call_operand.vmem [shape: f32[1,2,128], index: 3, kind: output, shape index: {1}]  }
   0x1   :  { %v609_v0 = vld [vmem:[%s772_s1 + $0x40] sm:$0xff]   ;;  %v611_v2 = vld [vmem:[%s772_s1 + $0x48] sm:$0xff]   ;;  %v613_v4 = vld [vmem:[%s772_s1 + $0x50] sm:$0xff]  }
   0x2   :  { %v610_v1 = vld [vmem:[%s772_s1] sm:$0xff]   ;;  %535 = vmatprep.subr.bf16.mxu0 %v609_v0  ;;  %593 = vmatprep.subr.bf16.mxu1 %v609_v0  ;;  %v612_v3 = vld [vmem:[%s772_s1 + $0x8] sm:$0xff]   ;;  %v614_v5 = vld [vmem:[%s772_s1 + $0x10] sm:$0xff]  }
   0x3   :  { %536 = vmatpush3.bf16.msra.mxu0 %v610_v1  ;;  %601 = vmatpush3.bf16.msra.mxu1 %v610_v1  ;;  %v615_v6 = vld [vmem:[%s772_s1 + $0x58] sm:$0xff]   ;;  %v617_v8 = vld [vmem:[%s772_s1 + $0x60] sm:$0xff]   ;;  %v619_v10 = vld [vmem:[%s772_s1 + $0x68] sm:$0xff]  }
   0x4   :  { %537 = vmatprep.subr.bf16.mxu0 %v611_v2  ;;  %594 = vmatprep.subr.bf16.mxu1 %v611_v2  ;;  %v616_v7 = vld [vmem:[%s772_s1 + $0x18] sm:$0xff]   ;;  %v618_v9 = vld [vmem:[%s772_s1 + $0x20] sm:$0xff]   ;;  %v620_v13 = vld [vmem:[%s772_s1 + $0x28] sm:$0xff]  }
   0x5   :  { %v627_v11 = vld [vmem:[%s773_s0 + $0x4] ss:$12 sps:$4 sm:$0xff]   ;;  %v630_v12 = vld [vmem:[%s773_s0 + $0x4c] ss:$12 sps:$4 sm:$0xff]   ;;  %v628_v20 = vld [vmem:[%s773_s0 + $0x48] ss:$12 sps:$4 sm:$0xff]  }
   0x6   :  { %v621_v14 = vld [vmem:[%s772_s1 + $0x70] sm:$0xff]   ;;  %279 = vmatprep.mubr.bf16.mxu0 %v627_v11  ;;  %303 = vmatprep.mubr.bf16.mxu1 %v630_v12  ;;  %v623_v16 = vld [vmem:[%s772_s1 + $0x78] sm:$0xff]   ;;  %v631_v18 = vld [vmem:[%s772_s1 + $0x80] sm:$0xff]  }
   0x7   :  { %538 = vmatpush3.bf16.msra.mxu0 %v612_v3  ;;  %602 = vmatpush3.bf16.msra.mxu1 %v612_v3  ;;  %v622_v15 = vld [vmem:[%s772_s1 + $0x30] sm:$0xff]   ;;  %v624_v17 = vld [vmem:[%s772_s1 + $0x38] sm:$0xff]   ;;  %v625_v19 = vld [vmem:[%s773_s0] ss:$12 sps:$4 sm:$0xff]  }
   0x8   :  { %539 = vmatprep.subr.bf16.mxu0 %v613_v4  ;;  %595 = vmatprep.subr.bf16.mxu1 %v613_v4  ;;  %v633_v21 = vld [vmem:[%s773_s0 + $0x1c] ss:$12 sps:$4 sm:$0xff]   ;;  %v636_v24 = vld [vmem:[%s773_s0 + $0x18] ss:$12 sps:$4 sm:$0xff]   ;;  %v637_v25 = vld [vmem:[%s773_s0 + $0x20] ss:$12 sps:$4 sm:$0xff]  }
   0x9   :  { %v632_v22 = vld [vmem:[%s772_s1 + $0x88] sm:$0xff]   ;;  %v638_v26 = vld [vmem:[%s773_s0 + $0x34] ss:$12 sps:$4 sm:$0xff]   ;;  %v640_v27 = vld [vmem:[%s773_s0 + $0x38] ss:$12 sps:$4 sm:$0xff]  }
   0xa   :  { %v635_v23 = vld [vmem:[%s773_s0 + $0x8] ss:$12 sps:$4 sm:$0xff]   ;;  %v641_v28 = vld [vmem:[%s773_s0 + $0x30] ss:$12 sps:$4 sm:$0xff]  }
   0xb   :  { %540 = vmatpush3.bf16.msra.mxu0 %v614_v5  ;;  %603 = vmatpush3.bf16.msra.mxu1 %v614_v5  ;;  %v642_v29 = vld [vmem:[%s773_s0 + $0x50] ss:$12 sps:$4 sm:$0xff]  }
   0xc   :  { %541 = vmatprep.subr.bf16.mxu0 %v615_v6  ;;  %596 = vmatprep.subr.bf16.mxu1 %v615_v6 }
   0xf   :  { %542 = vmatpush3.bf16.msra.mxu0 %v616_v7  ;;  %604 = vmatpush3.bf16.msra.mxu1 %v616_v7 }
  0x10   :  { %543 = vmatprep.subr.bf16.mxu0 %v617_v8  ;;  %597 = vmatprep.subr.bf16.mxu1 %v617_v8 }
  0x13   :  { %544 = vmatpush3.bf16.msra.mxu0 %v618_v9  ;;  %605 = vmatpush3.bf16.msra.mxu1 %v618_v9 }
  0x14   :  { %545 = vmatprep.subr.bf16.mxu0 %v619_v10  ;;  %598 = vmatprep.subr.bf16.mxu1 %v619_v10 }
  0x17   :  { %546 = vmatpush3.bf16.msra.mxu0 %v620_v13  ;;  %606 = vmatpush3.bf16.msra.mxu1 %v620_v13 }
  0x18   :  { %547 = vmatprep.subr.bf16.mxu0 %v621_v14  ;;  %599 = vmatprep.subr.bf16.mxu1 %v621_v14 }
  0x1b   :  { %548 = vmatpush3.bf16.msra.mxu0 %v622_v15  ;;  %607 = vmatpush3.bf16.msra.mxu1 %v622_v15 }
  0x1c   :  { %549 = vmatprep.subr.bf16.mxu0 %v623_v16  ;;  %600 = vmatprep.subr.bf16.mxu1 %v623_v16 }
  0x1f   :  { %550 = vmatpush3.bf16.msra.mxu0 %v624_v17  ;;  %608 = vmatpush3.bf16.msra.mxu1 %v624_v17 }
  0x20   :  { %581 = vmatprep.subr.bf16.mxu1 %v631_v18 }
  0x22   :  { %280 = vmatmul.mubr.bf16.vlgmr.msra.gmra.mrb[0].mxu0 %v625_v19  ;;  %304 = vmatmul.mubr.bf16.vlgmr.msra.gmra.mrb[0].mxu1 %v628_v20 }
  0x23   :  { %582 = vmatpush3.bf16.msra.mxu1 %v631_v18  ;;  %287 = vmatprep.mubr.bf16.mxu0 %v633_v21 }
  0x24   :  { %583 = vmatprep.subr.bf16.mxu1 %v632_v22  ;;  %585 = vmatprep.mubr.msk.bf16.mxu1 %vm234_vm0, %v635_v23 }
  0x27   :  { %584 = vmatpush3.bf16.msra.mxu1 %v632_v22 }
  0x2a   :  { %288 = vmatmul.mubr.bf16.gmra.mrb[4].mxu0 %v636_v24  ;;  %586 = vmatmul.mubr.msk.bf16.vlgmr.msra.gmra.mrb[4].mxu1 %vm234_vm0, %v637_v25 }
  0x2b   :  { %295 = vmatprep.mubr.bf16.mxu0 %v638_v26  ;;  %589 = vmatprep.mubr.msk.bf16.mxu1 %vm234_vm0, %v640_v27 }
  0x32   :  { %296 = vmatmul.mubr.bf16.gmra.mrb[8].mxu0 %v641_v28  ;;  %590 = vmatmul.mubr.msk.bf16.gmra.mrb[8].mxu1 %vm234_vm0, %v642_v29 }
  0xf5   :  { %v551_v30 = vpop.f32.mrb[0].mxu0  ;;  %v569_v31 = vpop.f32.mrb[0].mxu1 }
  0xf6   :  { %v552_v32 = vpop.f32.mrb[1].mxu0  ;;  %v570_v33 = vpop.f32.mrb[1].mxu1 }
  0xf7   :  { %v553_v34 = vadd.f32 %v552_v32, %v551_v30  ;;  %v571_v35 = vadd.f32 %v570_v33, %v569_v31  ;;  %v554_v36 = vpop.f32.mrb[2].mxu0  ;;  %v572_v37 = vpop.f32.mrb[2].mxu1 }
  0xf8   :  { %v555_v38 = vpop.f32.mrb[3].mxu0  ;;  %v573_v39 = vpop.f32.mrb[3].mxu1 }
  0xf9   :  { %v556_v40 = vadd.f32 %v555_v38, %v554_v36  ;;  %v574_v41 = vadd.f32 %v573_v39, %v572_v37 }
  0xfd   :  { %v557_v42 = vpop.f32.mrb[4].mxu0  ;;  %v587_v43 = vpop.f32.mrb[4].mxu1 }
  0xfe   :  { %v558_v44 = vpop.f32.mrb[5].mxu0  ;;  %v346_v45 = vpop.f32.mrb[5].mxu1 }
  0xff   :  { %v559_v46 = vadd.f32 %v558_v44, %v557_v42  ;;  %v347_v47 = vadd.f32 %v553_v34, %v346_v45  ;;  %v560_v48 = vpop.f32.mrb[6].mxu0  ;;  %v588_v49 = vpop.f32.mrb[6].mxu1 }
 0x100   :  { %v561_v50 = vpop.f32.mrb[7].mxu0  ;;  %v349_v51 = vpop.f32.mrb[7].mxu1 }
 0x101   :  { %v355_v52 = vadd.f32 %v587_v43, %v559_v46  ;;  %v562_v53 = vadd.f32 %v561_v50, %v560_v48  ;;  %v350_v54 = vadd.f32 %v556_v40, %v349_v51  ;;  %v430_v58 = vmul.f32 %v347_v47, %v347_v47 }
 0x103   :  { %v358_v55 = vadd.f32 %v588_v49, %v562_v53  ;;  %v515_v56 = vpack.c.bf16 %v350_v54, %v347_v47  ;;  %v417_v57 = vadd.f32 %v350_v54, %v347_v47  ;;  %v431_v59 = vmul.f32 %v350_v54, %v350_v54 }
 0x104   :  { %v432_v0 = vmul.f32 %v355_v52, %v355_v52 }
 0x105   :  { %v520_v60 = vpack.c.bf16 %v358_v55, %v355_v52  ;;  %516 = vst [vmem:[%s774_s2] sm:$0xff] %v515_v56   ;;  %v418_v61 = vadd.f32 %v417_v57, %v355_v52  ;;  %v563_v62 = vpop.f32.mrb[8].mxu0  ;;  %v591_v63 = vpop.f32.mrb[8].mxu1  ;;  %v438_v1 = vadd.f32 %v431_v59, %v430_v58  ;;  %v433_v9 = vmul.f32 %v358_v55, %v358_v55 }
 0x106   :  { %v371_v2 = vadd.f32 %v591_v63, %v571_v35  ;;  %v564_v3 = vpop.f32.mrb[9].mxu0  ;;  %v362_v4 = vpop.f32.mrb[9].mxu1 }
 0x107   :  { %532 = vst [vmem:[%s774_s2 + $0x8] sm:$0xff] %v520_v60   ;;  %v565_v5 = vadd.f32 %v564_v3, %v563_v62  ;;  %v419_v6 = vadd.f32 %v418_v61, %v358_v55  ;;  %v566_v7 = vpop.f32.mrb[10].mxu0  ;;  %v592_v8 = vpop.f32.mrb[10].mxu1  ;;  %v439_v10 = vadd.f32 %v438_v1, %v432_v0 }
 0x108   :  { %v374_v11 = vadd.f32 %v592_v8, %v574_v41  ;;  %v567_v12 = vpop.f32.mrb[11].mxu0  ;;  %v365_v13 = vpop.f32.mrb[11].mxu1  ;;  %v436_v25 = vmul.f32 %v371_v2, %v371_v2 }
 0x109   :  { %v363_v14 = vadd.f32 %v565_v5, %v362_v4  ;;  %v568_v15 = vadd.f32 %v567_v12, %v566_v7  ;;  %v440_v16 = vadd.f32 %v439_v10, %v433_v9 }
 0x10a   :  { %v530_v17 = vpack.c.bf16 %v374_v11, %v371_v2  ;;  %v437_v28 = vmul.f32 %v374_v11, %v374_v11 }
 0x10b   :  { %v420_v18 = vadd.f32 %v419_v6, %v363_v14  ;;  %v434_v19 = vmul.f32 %v363_v14, %v363_v14  ;;  %v366_v20 = vadd.f32 %v568_v15, %v365_v13 }
 0x10c   :  { %534 = vst [vmem:[%s774_s2 + $0x18] sm:$0xff] %v530_v17  }
 0x10d   :  { %v441_v21 = vadd.f32 %v440_v16, %v434_v19  ;;  %v525_v22 = vpack.c.bf16 %v366_v20, %v363_v14  ;;  %v421_v23 = vadd.f32 %v420_v18, %v366_v20  ;;  %v435_v24 = vmul.f32 %v366_v20, %v366_v20 }
 0x10f   :  { %533 = vst [vmem:[%s774_s2 + $0x10] sm:$0xff] %v525_v22   ;;  %v422_v26 = vadd.f32 %v421_v23, %v371_v2  ;;  %v442_v27 = vadd.f32 %v441_v21, %v435_v24 }
 0x111   :  { %v423_v29 = vadd.f32 %v422_v26, %v374_v11  ;;  %v443_v30 = vadd.f32 %v442_v27, %v436_v25 }
 0x113   :  { %v424_v31 = vrot.slane %v423_v29, 4  ;;  %v444_v32 = vadd.f32 %v443_v30, %v437_v28 }
 0x115   :  { %v425_v33 = vadd.f32 %v424_v31, %v423_v29  ;;  %v445_v34 = vrot.slane %v444_v32, 4 }
 0x117   :  { %v426_v35 = vrot.slane %v425_v33, 2  ;;  %v446_v36 = vadd.f32 %v445_v34, %v444_v32 }
 0x119   :  { %v427_v37 = vadd.f32 %v426_v35, %v425_v33  ;;  %v447_v38 = vrot.slane %v446_v36, 2 }
 0x11b   :  { %v428_v39 = vrot.slane %v427_v37, 1  ;;  %v448_v40 = vadd.f32 %v447_v38, %v446_v36 }
 0x11d   :  { %v449_v41 = vrot.slane %v448_v40, 1  ;;  %v429_v42 = vadd.f32 %v428_v39, %v427_v37 }
 0x11f   :  { %v450_v43 = vadd.f32 %v449_v41, %v448_v40 }
 0x121   :  { %v452_v44 = vsel %vm451_vm1, %v429_v42, %v450_v43 }
 0x122   :  { %453 = vst [vmem:[%s775_s3] sm:$0x3] %v452_v44 }

</bundles_post_ra>
